<compile_context>
chip_gen: v7x
topology: tpu7x:2x2x1
jax: 0.10.0
libtpu: 0.0.40
codegen_flags: <defaults>
</compile_context>

<pallas_src>
import functools

import jax
import jax.numpy as jnp
from jax import lax
from jax.experimental import pallas as pl
from jax.experimental.pallas import tpu as pltpu


def _self_attention_kernel(x_ref, wq_ref, bq_ref, wk_ref, bk_ref, wv_ref, bv_ref,
                           gamma_ref, out_ref, *rest,
                           block_q, matmul_dtype, with_attn):
    # x_ref:   (1, C, N)  — one full batch element, resident across all q-tiles
    # wq/wk:   (dk, C)    — Conv2d weights as (Cout, Cin); wv: (C, C)
    # biases:  (dk, 1) / (C, 1); gamma: (1, 1) scalar in SMEM
    # out_ref: (1, C, TQ) lane-dense output tile; attn_ref (optional): (1, TQ, N)
    if with_attn:
        attn_ref, k_sc, v_sc = rest
    else:
        attn_ref = None
        k_sc, v_sc = rest

    qi = pl.program_id(1)
    md = matmul_dtype

    # Stage K (dk, N) and V (C, N) for the whole batch element once per b.
    # Two separate dots writing straight into scratch: no wide (N, 2dk+C) temp,
    # no misaligned column slices, and scratch lives in matmul_dtype so the
    # full-N tiles are not re-cast on every q-tile step.
    @pl.when(qi == 0)
    def _():
        xf = x_ref[0].astype(md)                                        # (C, N)
        k = jnp.dot(wk_ref[...].astype(md), xf,
                    preferred_element_type=jnp.float32) + bk_ref[...]
        v = jnp.dot(wv_ref[...].astype(md), xf,
                    preferred_element_type=jnp.float32) + bv_ref[...]
        k_sc[...] = k.astype(k_sc.dtype)
        v_sc[...] = v.astype(v_sc.dtype)

    row0 = pl.multiple_of(qi * block_q, block_q)
    x_t = x_ref[0, :, pl.ds(row0, block_q)]                             # (C, TQ) f32

    # Per-tile Q projection (cheap (dk,C)x(C,TQ) MXU work; no full-N Q scratch).
    q_t = jnp.dot(wq_ref[...].astype(md), x_t.astype(md),
                  preferred_element_type=jnp.float32) + bq_ref[...]     # (dk, TQ)

    # energy[i, j] = sum_d q_t[d, i] * k[d, j]  (contract the small dk dim)
    energy = lax.dot_general(q_t.astype(md), k_sc[...],
                             dimension_numbers=(((0,), (0,)), ((), ())),
                             preferred_element_type=jnp.float32)        # (TQ, N)

    # numerically stable softmax over the N (lane) axis; reciprocal + multiply
    m = jnp.max(energy, axis=-1, keepdims=True)
    p = jnp.exp(energy - m)
    inv = pl.reciprocal(jnp.sum(p, axis=-1, keepdims=True), approx=False)
    attn = p * inv                                                      # (TQ, N)
    if with_attn:
        attn_ref[0] = attn.astype(attn_ref.dtype)

    # out^T[c, i] = sum_j v[c, j] * attn[i, j]  (== torch bmm(value, attn^T))
    out_t = lax.dot_general(v_sc[...], attn.astype(md),
                            dimension_numbers=(((1,), (1,)), ((), ())),
                            preferred_element_type=jnp.float32)         # (C, TQ)

    # residual from the already-resident (C, N) x block; lane-dense (C, TQ) store
    out_ref[0] = (gamma_ref[0, 0] * out_t + x_t).astype(out_ref.dtype)


def _vmem_capacity_bytes():
    """Physical VMEM of the current chip (falls back to v7x's 64 MiB)."""
    try:
        return int(pltpu.get_tpu_info().vmem_capacity_bytes)
    except Exception:
        return 64 * 2**20


def _estimate_vmem_bytes(N, C, dk, block_q, md_bytes, attn_bytes, with_attn):
    weights = 2 * 4 * (2 * dk * C + C * C + 2 * dk + C)   # double-buffered f32 weights+biases
    x_block = 2 * 4 * C * N                               # resident x block (double-buffered)
    scratch = md_bytes * (dk + C) * N                     # K + V scratch
    out_tiles = 2 * 4 * C * block_q                       # out tile, double-buffered
    attn_tiles = 2 * attn_bytes * block_q * N if with_attn else 0
    live = 3 * 4 * block_q * N                            # energy / p / attn intermediates
    return weights + x_block + scratch + out_tiles + attn_tiles + live


def _pick_block_q(N, C, dk, md_bytes, attn_bytes, with_attn, budget):
    """Largest 128-multiple divisor of N whose footprint fits the VMEM budget."""
    if N % 128 != 0:
        return N  # full-extent block is always layout-legal
    best = None
    for t in range(128, N + 1, 128):
        if N % t:
            continue
        if best is None:
            best = t
        if _estimate_vmem_bytes(N, C, dk, t, md_bytes, attn_bytes, with_attn) <= budget:
            best = t
    return best if best is not None else N


def self_attention_pallas(x_nchw, wq, bq, wk, bk, wv, bv, gamma, *,
                          block_q=None, matmul_dtype=jnp.bfloat16,
                          attn_dtype=jnp.float32, return_attention=True):
    """x_nchw: (B, C, W, H) f32. wq/wk: (C, C//8), wv: (C, C), 1-D biases, scalar gamma.

    Returns (out (B,C,W,H), attention (B,N,N)) when return_attention=True (the
    module's semantics), else just out.  matmul_dtype=bf16 (default) runs the
    MXU natively with f32 accumulation; pass jnp.float32 for bit-tight results.
    """
    B, C, W, H = x_nchw.shape
    N = W * H
    dk = wq.shape[1]

    # NCHW -> (B, C, N): a pure reshape (torch's .view(B, C, W*H)); no transpose.
    x_bcn = x_nchw.reshape(B, C, N).astype(jnp.float32)

    # Conv2d(Cin, Cout, 1) == matmul; store weights as (Cout, Cin) so the
    # staging and Q-projection dots are canonical (M,K)x(K,N).
    wq_t = jnp.asarray(wq, jnp.float32).T              # (dk, C)
    wk_t = jnp.asarray(wk, jnp.float32).T              # (dk, C)
    wv_t = jnp.asarray(wv, jnp.float32).T              # (C, C)
    bq2 = jnp.asarray(bq, jnp.float32).reshape(dk, 1)
    bk2 = jnp.asarray(bk, jnp.float32).reshape(dk, 1)
    bv2 = jnp.asarray(bv, jnp.float32).reshape(C, 1)
    gamma2 = jnp.asarray(gamma, jnp.float32).reshape(1, 1)

    md_bytes = jnp.dtype(matmul_dtype).itemsize
    attn_bytes = jnp.dtype(attn_dtype).itemsize

    # Generation-aware VMEM budget (v7x: 64 MiB physical; v5e/v6e: 128 MiB).
    vmem_cap = _vmem_capacity_bytes()
    vmem_budget = (vmem_cap * 3) // 4

    if block_q is None:
        block_q = _pick_block_q(N, C, dk, md_bytes, attn_bytes,
                                return_attention, vmem_budget)
    assert block_q == N or (block_q % 128 == 0 and N % block_q == 0), (N, block_q)

    est = _estimate_vmem_bytes(N, C, dk, block_q, md_bytes, attn_bytes,
                               return_attention)
    vmem_limit = int(min(vmem_budget, max(32 * 2**20, 2 * est)))

    kernel = functools.partial(_self_attention_kernel, block_q=block_q,
                               matmul_dtype=matmul_dtype,
                               with_attn=return_attention)

    flops_per_b = (4 * N * C * dk + 2 * N * C * C      # Q,K,V projections
                   + 2 * N * N * dk + 2 * N * N * C)   # energy + attn@V
    bytes_acc = (8 * B * C * N
                 + (attn_bytes * B * N * N if return_attention else 0)
                 + 4 * (2 * dk * C + C * C + 2 * dk + C))
    cost = pl.CostEstimate(flops=int(B * flops_per_b),
                           transcendentals=int(B * N * N),
                           bytes_accessed=int(bytes_acc))

    const = lambda b, qi: (0, 0)
    if return_attention:
        out_shape = (jax.ShapeDtypeStruct((B, C, N), jnp.float32),
                     jax.ShapeDtypeStruct((B, N, N), attn_dtype))
        out_specs = (pl.BlockSpec((1, C, block_q), lambda b, qi: (b, 0, qi)),
                     pl.BlockSpec((1, block_q, N), lambda b, qi: (b, qi, 0)))
    else:
        out_shape = jax.ShapeDtypeStruct((B, C, N), jnp.float32)
        out_specs = pl.BlockSpec((1, C, block_q), lambda b, qi: (b, 0, qi))

    results = pl.pallas_call(
        kernel,
        out_shape=out_shape,
        grid_spec=pltpu.PrefetchScalarGridSpec(
            num_scalar_prefetch=0,
            grid=(B, N // block_q),
            in_specs=[
                pl.BlockSpec((1, C, N), lambda b, qi: (b, 0, 0)),   # x (per batch, reused)
                pl.BlockSpec((dk, C), const),                       # Wq (Cout, Cin)
                pl.BlockSpec((dk, 1), const),                       # bq
                pl.BlockSpec((dk, C), const),                       # Wk
                pl.BlockSpec((dk, 1), const),                       # bk
                pl.BlockSpec((C, C), const),                        # Wv
                pl.BlockSpec((C, 1), const),                        # bv
                pl.BlockSpec(memory_space=pltpu.MemorySpace.SMEM),  # gamma scalar
            ],
            out_specs=out_specs,
            scratch_shapes=[
                pltpu.VMEM((dk, N), matmul_dtype),   # K (staged once per batch elem)
                pltpu.VMEM((C, N), matmul_dtype),    # V
            ],
        ),
        compiler_params=pltpu.CompilerParams(
            dimension_semantics=("parallel", "arbitrary"),
            vmem_limit_bytes=vmem_limit),
        cost_estimate=cost,
    )(x_bcn, wq_t, bq2, wk_t, bk2, wv_t, bv2, gamma2)

    if return_attention:
        out_bcn, attn = results
        return out_bcn.reshape(B, C, W, H), attn
    return results.reshape(B, C, W, H)


def _reference_forward(x_nchw, wq, bq, wk, bk, wv, bv, gamma):
    """Plain-JAX mirror of the PyTorch forward (for correctness checking)."""
    B, C, W, H = x_nchw.shape
    N = W * H
    x_bnc = x_nchw.reshape(B, C, N).transpose(0, 2, 1)
    q = x_bnc @ wq + bq              # (B, N, dk)
    k = x_bnc @ wk + bk              # (B, N, dk)
    v = x_bnc @ wv + bv              # (B, N, C)
    energy = jnp.einsum("bnd,bmd->bnm", q, k)
    attn = jax.nn.softmax(energy, axis=-1)
    out = jnp.einsum("bnm,bmc->bnc", attn, v)
    out = gamma * out + x_bnc
    return out.transpose(0, 2, 1).reshape(B, C, W, H), attn


if __name__ == "__main__":
    # Small shapes consistent with the module (in_dim divisible by 8).
    B, C, W, H = 2, 32, 16, 16
    dk = C // 8
    N = W * H

    key = jax.random.PRNGKey(0)
    kx, kq, kk, kv, kbq, kbk, kbv = jax.random.split(key, 7)

    x = jax.random.normal(kx, (B, C, W, H), dtype=jnp.float32)
    # Conv2d(Cin, Cout, 1) weight as the equivalent (Cin, Cout) matmul weight.
    wq = jax.random.normal(kq, (C, dk), dtype=jnp.float32) * 0.1
    wk = jax.random.normal(kk, (C, dk), dtype=jnp.float32) * 0.1
    wv = jax.random.normal(kv, (C, C), dtype=jnp.float32) * 0.1
    bq = jax.random.normal(kbq, (dk,), dtype=jnp.float32) * 0.1
    bk = jax.random.normal(kbk, (dk,), dtype=jnp.float32) * 0.1
    bv = jax.random.normal(kbv, (C,), dtype=jnp.float32) * 0.1
    # Module init is gamma = 0; use nonzero so the residual-scale path is tested.
    gamma = jnp.float32(0.1)

    out_want, attn_want = _reference_forward(x, wq, bq, wk, bk, wv, bv, gamma)

    # 1) f32 path, explicit block_q=128 (two q-tiles per batch), with attention:
    #    bit-tight check against the f32 reference.
    out, attn = self_attention_pallas(x, wq, bq, wk, bk, wv, bv, gamma,
                                      block_q=128, matmul_dtype=jnp.float32)
    out = jax.block_until_ready(out)
    attn = jax.block_until_ready(attn)
    assert out.shape == (B, C, W, H) and attn.shape == (B, N, N)
    assert jnp.allclose(out, out_want, atol=1e-4, rtol=1e-4), \
        float(jnp.max(jnp.abs(out - out_want)))
    assert jnp.allclose(attn, attn_want, atol=1e-4, rtol=1e-4), \
        float(jnp.max(jnp.abs(attn - attn_want)))

    # 2) bf16-MXU path, auto block_q, attention output dropped entirely (the
    #    single biggest HBM/VMEM saving when the caller only needs `out`).
    #    bf16 matmuls diverge from the f32 reference -> looser tolerance.
    out_bf16 = self_attention_pallas(x, wq, bq, wk, bk, wv, bv, gamma,
                                     matmul_dtype=jnp.bfloat16,
                                     return_attention=False)
    out_bf16 = jax.block_until_ready(out_bf16)
    assert out_bf16.shape == (B, C, W, H)
    assert jnp.allclose(out_bf16, out_want, atol=3e-2, rtol=3e-2), \
        float(jnp.max(jnp.abs(out_bf16 - out_want)))

    print("KERNEL_OK")
</pallas_src>

<mosaic_0001>
module attributes {stable_mosaic.version = 11 : i64} {
  func.func @_self_attention_kernel(%arg0: i32, %arg1: i32, %arg2: memref<1x32x256xf32, #tpu.memory_space<vmem>>, %arg3: memref<4x32xf32, #tpu.memory_space<vmem>>, %arg4: memref<4x1xf32, #tpu.memory_space<vmem>>, %arg5: memref<4x32xf32, #tpu.memory_space<vmem>>, %arg6: memref<4x1xf32, #tpu.memory_space<vmem>>, %arg7: memref<32x32xf32, #tpu.memory_space<vmem>>, %arg8: memref<32x1xf32, #tpu.memory_space<vmem>>, %arg9: memref<1x1xf32, #tpu.memory_space<smem>>, %arg10: memref<1x32x128xf32, #tpu.memory_space<vmem>>, %arg11: memref<1x128x256xf32, #tpu.memory_space<vmem>>, %arg12: memref<4x256xf32, #tpu.memory_space<vmem>>, %arg13: memref<32x256xf32, #tpu.memory_space<vmem>>) attributes {dimension_semantics = [#tpu.dimension_semantics<parallel>, #tpu.dimension_semantics<arbitrary>], iteration_bounds = array<i64: 2, 2>, scalar_prefetch = 0 : i64, scratch_operands = 2 : i64, tpu.core_type = #tpu.core_type<tc>, window_params = [{transform_indices = @transform_0, window_bounds = array<i64: 1, 32, 256>}, {pipeline_mode = #tpu.pipeline_mode<synchronous>, transform_indices = @transform_1, window_bounds = array<i64: 4, 32>}, {pipeline_mode = #tpu.pipeline_mode<synchronous>, transform_indices = @transform_2, window_bounds = array<i64: 4, 1>}, {pipeline_mode = #tpu.pipeline_mode<synchronous>, transform_indices = @transform_3, window_bounds = array<i64: 4, 32>}, {pipeline_mode = #tpu.pipeline_mode<synchronous>, transform_indices = @transform_4, window_bounds = array<i64: 4, 1>}, {pipeline_mode = #tpu.pipeline_mode<synchronous>, transform_indices = @transform_5, window_bounds = array<i64: 32, 32>}, {pipeline_mode = #tpu.pipeline_mode<synchronous>, transform_indices = @transform_6, window_bounds = array<i64: 32, 1>}, {transform_indices = @transform_7, window_bounds = array<i64: 1, 1>}, {transform_indices = @transform_8, window_bounds = array<i64: 1, 32, 128>}, {transform_indices = @transform_9, window_bounds = array<i64: 1, 128, 256>}]} {
    %c0_i32 = arith.constant 0 : i32
    %0 = arith.cmpi eq, %arg1, %c0_i32 : i32
    %1 = arith.extui %0 : i1 to i32
    %c0_i32_0 = arith.constant 0 : i32
    %2 = arith.cmpi ne, %1, %c0_i32_0 : i32
    scf.if %2 {
      %c0_22 = arith.constant 0 : index
      %c0_23 = arith.constant 0 : index
      %c0_24 = arith.constant 0 : index
      %37 = vector.load %arg2[%c0_22, %c0_23, %c0_24] : memref<1x32x256xf32, #tpu.memory_space<vmem>>, vector<1x32x256xf32>
      %38 = vector.shape_cast %37 : vector<1x32x256xf32> to vector<32x256xf32>
      %c0_25 = arith.constant 0 : index
      %c0_26 = arith.constant 0 : index
      %39 = vector.load %arg5[%c0_25, %c0_26] : memref<4x32xf32, #tpu.memory_space<vmem>>, vector<4x32xf32>
      %cst_27 = arith.constant dense<0.000000e+00> : vector<4x256xf32>
      %40 = tpu.matmul %39, %38, %cst_27 {dimension_numbers = #tpu.dot_dimension_numbers<[1], [0], [0], [1], [0, 0, 1, 1], [], []>} : vector<4x32xf32>, vector<32x256xf32>, vector<4x256xf32> -> vector<4x256xf32>
      %c0_28 = arith.constant 0 : index
      %c0_29 = arith.constant 0 : index
      %41 = vector.load %arg6[%c0_28, %c0_29] : memref<4x1xf32, #tpu.memory_space<vmem>>, vector<4x1xf32>
      %42 = vector.broadcast %41 : vector<4x1xf32> to vector<4x256xf32>
      %43 = arith.addf %40, %42 : vector<4x256xf32>
      %c0_30 = arith.constant 0 : index
      %c0_31 = arith.constant 0 : index
      %44 = vector.load %arg7[%c0_30, %c0_31] : memref<32x32xf32, #tpu.memory_space<vmem>>, vector<32x32xf32>
      %cst_32 = arith.constant dense<0.000000e+00> : vector<32x256xf32>
      %45 = tpu.matmul %44, %38, %cst_32 {dimension_numbers = #tpu.dot_dimension_numbers<[1], [0], [0], [1], [0, 0, 1, 1], [], []>} : vector<32x32xf32>, vector<32x256xf32>, vector<32x256xf32> -> vector<32x256xf32>
      %c0_33 = arith.constant 0 : index
      %c0_34 = arith.constant 0 : index
      %46 = vector.load %arg8[%c0_33, %c0_34] : memref<32x1xf32, #tpu.memory_space<vmem>>, vector<32x1xf32>
      %47 = vector.broadcast %46 : vector<32x1xf32> to vector<32x256xf32>
      %48 = arith.addf %45, %47 : vector<32x256xf32>
      %c0_35 = arith.constant 0 : index
      %c0_36 = arith.constant 0 : index
      %49 = vector.load %arg12[%c0_35, %c0_36] : memref<4x256xf32, #tpu.memory_space<vmem>>, vector<4x256xf32>
      tpu.vector_store %arg12[%c0_35, %c0_36], %43 {strides = array<i32>} : memref<4x256xf32, #tpu.memory_space<vmem>>, vector<4x256xf32>,
      %c0_37 = arith.constant 0 : index
      %c0_38 = arith.constant 0 : index
      %50 = vector.load %arg13[%c0_37, %c0_38] : memref<32x256xf32, #tpu.memory_space<vmem>>, vector<32x256xf32>
      tpu.vector_store %arg13[%c0_37, %c0_38], %48 {strides = array<i32>} : memref<32x256xf32, #tpu.memory_space<vmem>>, vector<32x256xf32>,
    } else {
    }
    %c128_i32 = arith.constant 128 : i32
    %3 = arith.muli %arg1, %c128_i32 : i32
    %4 = tpu.assume_multiple %3, 128 : i32
    %c0 = arith.constant 0 : index
    %c0_1 = arith.constant 0 : index
    %5 = arith.index_cast %4 : i32 to index
    %6 = vector.load %arg2[%c0, %c0_1, %5] : memref<1x32x256xf32, #tpu.memory_space<vmem>>, vector<1x32x128xf32>
    %7 = vector.shape_cast %6 : vector<1x32x128xf32> to vector<32x128xf32>
    %c0_2 = arith.constant 0 : index
    %c0_3 = arith.constant 0 : index
    %8 = vector.load %arg3[%c0_2, %c0_3] : memref<4x32xf32, #tpu.memory_space<vmem>>, vector<4x32xf32>
    %cst = arith.constant dense<0.000000e+00> : vector<4x128xf32>
    %9 = tpu.matmul %8, %7, %cst {dimension_numbers = #tpu.dot_dimension_numbers<[1], [0], [0], [1], [0, 0, 1, 1], [], []>} : vector<4x32xf32>, vector<32x128xf32>, vector<4x128xf32> -> vector<4x128xf32>
    %c0_4 = arith.constant 0 : index
    %c0_5 = arith.constant 0 : index
    %10 = vector.load %arg4[%c0_4, %c0_5] : memref<4x1xf32, #tpu.memory_space<vmem>>, vector<4x1xf32>
    %11 = vector.broadcast %10 : vector<4x1xf32> to vector<4x128xf32>
    %12 = arith.addf %9, %11 : vector<4x128xf32>
    %c0_6 = arith.constant 0 : index
    %c0_7 = arith.constant 0 : index
    %13 = vector.load %arg12[%c0_6, %c0_7] : memref<4x256xf32, #tpu.memory_space<vmem>>, vector<4x256xf32>
    %cst_8 = arith.constant dense<0.000000e+00> : vector<128x256xf32>
    %14 = tpu.matmul %12, %13, %cst_8 {dimension_numbers = #tpu.dot_dimension_numbers<[0], [0], [1], [1], [0, 1, 1, 1], [], []>} : vector<4x128xf32>, vector<4x256xf32>, vector<128x256xf32> -> vector<128x256xf32>
    %cst_9 = arith.constant dense<0xFF800000> : vector<128xf32>
    %15 = vector.multi_reduction <maximumf>, %14, %cst_9 [1] : vector<128x256xf32> to vector<128xf32>
    %16 = vector.shape_cast %15 : vector<128xf32> to vector<128x1xf32>
    %17 = vector.broadcast %16 : vector<128x1xf32> to vector<128x256xf32>
    %18 = arith.subf %14, %17 : vector<128x256xf32>
    %19 = math.exp %18 : vector<128x256xf32>
    %cst_10 = arith.constant dense<0.000000e+00> : vector<128xf32>
    %20 = vector.multi_reduction <add>, %19, %cst_10 [1] : vector<128x256xf32> to vector<128xf32>
    %21 = vector.shape_cast %20 : vector<128xf32> to vector<128x1xf32>
    %22 = tpu.reciprocal %21 : vector<128x1xf32> -> vector<128x1xf32>
    %23 = vector.broadcast %22 : vector<128x1xf32> to vector<128x256xf32>
    %24 = arith.mulf %19, %23 : vector<128x256xf32>
    %c0_11 = arith.constant 0 : index
    %c0_12 = arith.constant 0 : index
    %c0_13 = arith.constant 0 : index
    %25 = vector.load %arg11[%c0_11, %c0_12, %c0_13] : memref<1x128x256xf32, #tpu.memory_space<vmem>>, vector<1x128x256xf32>
    %26 = vector.shape_cast %25 : vector<1x128x256xf32> to vector<128x256xf32>
    %27 = vector.shape_cast %24 : vector<128x256xf32> to vector<1x128x256xf32>
    tpu.vector_store %arg11[%c0_11, %c0_12, %c0_13], %27 {strides = array<i32>} : memref<1x128x256xf32, #tpu.memory_space<vmem>>, vector<1x128x256xf32>,
    %c0_14 = arith.constant 0 : index
    %c0_15 = arith.constant 0 : index
    %28 = vector.load %arg13[%c0_14, %c0_15] : memref<32x256xf32, #tpu.memory_space<vmem>>, vector<32x256xf32>
    %cst_16 = arith.constant dense<0.000000e+00> : vector<32x128xf32>
    %29 = tpu.matmul %28, %24, %cst_16 {dimension_numbers = #tpu.dot_dimension_numbers<[1], [1], [0], [0], [0, 0, 1, 0], [], []>} : vector<32x256xf32>, vector<128x256xf32>, vector<32x128xf32> -> vector<32x128xf32>
    %c0_17 = arith.constant 0 : index
    %c0_18 = arith.constant 0 : index
    %30 = memref.load %arg9[%c0_17, %c0_18] : memref<1x1xf32, #tpu.memory_space<smem>>
    %31 = vector.broadcast %30 : f32 to vector<32x128xf32>
    %32 = arith.mulf %31, %29 : vector<32x128xf32>
    %33 = arith.addf %32, %7 : vector<32x128xf32>
    %c0_19 = arith.constant 0 : index
    %c0_20 = arith.constant 0 : index
    %c0_21 = arith.constant 0 : index
    %34 = vector.load %arg10[%c0_19, %c0_20, %c0_21] : memref<1x32x128xf32, #tpu.memory_space<vmem>>, vector<1x32x128xf32>
    %35 = vector.shape_cast %34 : vector<1x32x128xf32> to vector<32x128xf32>
    %36 = vector.shape_cast %33 : vector<32x128xf32> to vector<1x32x128xf32>
    tpu.vector_store %arg10[%c0_19, %c0_20, %c0_21], %36 {strides = array<i32>} : memref<1x32x128xf32, #tpu.memory_space<vmem>>, vector<1x32x128xf32>,
    return
  }
  func.func @transform_0(%arg0: i32, %arg1: i32) -> (i32, i32, i32) {
    %c0_i32 = arith.constant 0 : i32
    %c0_i32_0 = arith.constant 0 : i32
    %c0_i32_1 = arith.constant 0 : i32
    return %arg0, %c0_i32, %c0_i32_0 : i32, i32, i32
  }
  func.func @transform_1(%arg0: i32, %arg1: i32) -> (i32, i32) {
    %c0_i32 = arith.constant 0 : i32
    %c0_i32_0 = arith.constant 0 : i32
    %c0_i32_1 = arith.constant 0 : i32
    return %c0_i32, %c0_i32_0 : i32, i32
  }
  func.func @transform_2(%arg0: i32, %arg1: i32) -> (i32, i32) {
    %c0_i32 = arith.constant 0 : i32
    %c0_i32_0 = arith.constant 0 : i32
    %c0_i32_1 = arith.constant 0 : i32
    return %c0_i32, %c0_i32_0 : i32, i32
  }
  func.func @transform_3(%arg0: i32, %arg1: i32) -> (i32, i32) {
    %c0_i32 = arith.constant 0 : i32
    %c0_i32_0 = arith.constant 0 : i32
    %c0_i32_1 = arith.constant 0 : i32
    return %c0_i32, %c0_i32_0 : i32, i32
  }
  func.func @transform_4(%arg0: i32, %arg1: i32) -> (i32, i32) {
    %c0_i32 = arith.constant 0 : i32
    %c0_i32_0 = arith.constant 0 : i32
    %c0_i32_1 = arith.constant 0 : i32
    return %c0_i32, %c0_i32_0 : i32, i32
  }
  func.func @transform_5(%arg0: i32, %arg1: i32) -> (i32, i32) {
    %c0_i32 = arith.constant 0 : i32
    %c0_i32_0 = arith.constant 0 : i32
    %c0_i32_1 = arith.constant 0 : i32
    return %c0_i32, %c0_i32_0 : i32, i32
  }
  func.func @transform_6(%arg0: i32, %arg1: i32) -> (i32, i32) {
    %c0_i32 = arith.constant 0 : i32
    %c0_i32_0 = arith.constant 0 : i32
    %c0_i32_1 = arith.constant 0 : i32
    return %c0_i32, %c0_i32_0 : i32, i32
  }
  func.func @transform_7(%arg0: i32, %arg1: i32) -> (i32, i32) {
    %c0_i32 = arith.constant 0 : i32
    %c0_i32_0 = arith.constant 0 : i32
    %c0_i32_1 = arith.constant 0 : i32
    return %c0_i32, %c0_i32_0 : i32, i32
  }
  func.func @transform_8(%arg0: i32, %arg1: i32) -> (i32, i32, i32) {
    %c0_i32 = arith.constant 0 : i32
    %c0_i32_0 = arith.constant 0 : i32
    return %arg0, %c0_i32, %arg1 : i32, i32, i32
  }
  func.func @transform_9(%arg0: i32, %arg1: i32) -> (i32, i32, i32) {
    %c0_i32 = arith.constant 0 : i32
    %c0_i32_0 = arith.constant 0 : i32
    return %arg0, %arg1, %c0_i32 : i32, i32, i32
  }
}

</mosaic_0001>

<bundles_post_ra>
// kernel: tpu_custom_call.1
= control target key start
LH: loop header
LB: loop body
LE: loop exit
PB: predicated region body
PF: predicated region fallthrough
CT: control target
= control target key end

     0   :  { %s2775_s0 = inlined_call_operand.hbm [shape: f32[2,32,256], index: 0, kind: input, shape index: {}]   ;;  %s2776_s1 = inlined_call_operand.vmem [shape: f32[4,32], index: 1, kind: input, shape index: {}]   ;;  %s2777_s2 = inlined_call_operand.vmem [shape: f32[4,1], index: 2, kind: input, shape index: {}]   ;;  %s2778_s3 = inlined_call_operand.vmem [shape: f32[4,32], index: 3, kind: input, shape index: {}]   ;;  %s2779_s4 = inlined_call_operand.vmem [shape: f32[4,1], index: 4, kind: input, shape index: {}]   ;;  %s2780_s5 = inlined_call_operand.vmem [shape: f32[32,32], index: 5, kind: input, shape index: {}]   ;;  %s2781_s6 = inlined_call_operand.vmem [shape: f32[32,1], index: 6, kind: input, shape index: {}]   ;;  %s2782_s7 = inlined_call_operand.<no memory space> [shape: f32[1,1], index: 7, kind: input, shape index: {}]   ;;  %s2783_s8 = inlined_call_operand.hbm [shape: f32[2,32,256], index: 8, kind: output, shape index: {0}]   ;;  %s2784_s9 = inlined_call_operand.hbm [shape: f32[2,256,256], index: 9, kind: output, shape index: {1}]  }
   0x1   :  { %2792 = sst [smem:[#allocation18_spill]] %s2775_s0 }
   0x2   :  { %2793 = sst [smem:[#allocation19_spill]] %s2776_s1 }
   0x3   :  { %2794 = sst [smem:[#allocation20_spill]] %s2777_s2 }
   0x4   :  { %2795 = sst [smem:[#allocation21_spill]] %s2778_s3 }
   0x5   :  { %2796 = sst [smem:[#allocation22_spill]] %s2783_s8 }
   0x6   :  { %2797 = sst [smem:[#allocation23_spill]] %s2784_s9 }
   0x7   :  { %15 = sst [smem:[#allocation4]] %s2782_s7 }
   0x8   :  { %16 = vsyncpa [#allocation6], 0 }
   0x9   :  { %18 = vsyncpa [#allocation6 + $0x1], 0 }
   0xa   :  { %19 = vsyncpa [#allocation7], 0 }
   0xb   :  { %21 = vsyncpa [#allocation7 + $0x1], 0 }
   0xc   :  { %22 = vsyncpa [#allocation10], 0 }
   0xd   :  { %24 = vsyncpa [#allocation10 + $0x1], 0  ;;  %s2112_s11 = smov 0   ;;  %s2114_s12 = smov 0  }
   0xe   :  { %s2116_s13 = smov 0   ;;  %s2118_s14 = smov 0  }
   0xf   :  { %s2120_s15 = smov 0   ;;  %s2122_s16 = smov 0  }
  0x10   :  { %s2124_s17 = smov 0   ;;  %s2126_s7 = smov 0  }
  0x11   :  { %s2128_s18 = smov 0   ;;  %s2130_s19 = smov 0  }
  0x12   :  { %s2132_s20 = smov 0  }
  0x13 LB: > { %2798 = sst [smem:[#allocation14_spill]] %s2034_s18  ;;  %s1497_s21 = sadd.s32 4294967295, %s2042_s20   ;;  %s2042_s20 = sphi %s2132_s20, %s30_s20   ;;  %s2038_s19 = sphi %s2130_s19, %s2819_s19   ;;  %s2034_s18 = sphi %s2128_s18, %s2826_s18   ;;  %s2030_s7 = sphi %s2126_s7, %s2817_s7   ;;  %s2026_s17 = sphi %s2124_s17, %s2816_s17   ;;  %s2022_s16 = sphi %s2122_s16, %s2825_s16   ;;  %s2018_s15 = sphi %s2120_s15, %s2824_s15   ;;  %s2014_s14 = sphi %s2118_s14, %s2823_s14   ;;  %s2010_s13 = sphi %s2116_s13, %s2822_s13   ;;  %s2006_s12 = sphi %s2114_s12, %s2821_s12   ;;  %s2002_s11 = sphi %s2112_s11, %s2820_s11  }
  0x14   : > { %2799 = sst [smem:[#allocation15_spill]] %s2038_s19  ;;  %s1498_s22 = sadd.s32 4294967294, %s2042_s20  }
  0x15   : > { %s39_s23 = sadd.s32 1, %s2034_s18  ;;  %s42_s24 = sadd.s32 1, %s2038_s19 }
  0x16   : > { %p40_p0 = scmp.ge.s32.totalorder %s39_s23, 2  ;;  %s49_s25 = sadd.s32 1, %s2022_s16 }
  0x17   : > { %p56_p1 = scmp.ne.s32.totalorder %s2022_s16, %s2018_s15  ;;  %p57_p2 = scmp.eq.s32.totalorder %s2042_s20, 0 }
  0x18   : > { %s2828_s23 = smov (%p40_p0, %s39_s23), 0  ;;  %s2830_s24 = smov (!%p40_p0, %s42_s24), %s2038_s19 }
  0x19   : > { %2800 = sst [smem:[#allocation16_spill]] %s2828_s23  ;;  %p2176_p3 = por %p57_p2, %p56_p1 }
  0x1a   : > { %p62_p4 = scmp.ne.s32.totalorder %s2018_s15, %s2014_s14  ;;  %p44_p5 = scmp.ge.s32.totalorder %s2830_s24, 2 }
  0x1b   : > { %p63_p6 = scmp.eq.s32.totalorder %s1497_s21, 0  ;;  %s220_s27 = ssub.s32 %s2034_s18, %s2828_s23 }
  0x1c   : > { %s224_s28 = sadd.s32 1, %s2010_s13  ;;  %s2832_s24 = smov (%p44_p5, %s2830_s24), 0 }
  0x1d   : > { %2802 = sst [smem:[#allocation17_spill]] %s2832_s24  ;;  %p2186_p7 = por %p63_p6, %p62_p4 }
  0x1e   : > { %p234_p8 = scmp.ne.s32.totalorder %s2010_s13, %s2006_s12  ;;  %s46_s30 = ssub.s32 %s2038_s19, %s2832_s24 }
  0x1f   : > { %p235_p9 = scmp.eq.s32.totalorder %s1497_s21, 3  ;;  %p47_p10 = scmp.eq.s32.totalorder %s46_s30, 0 }
  0x20   : > { %s221_s10 = sor.u32 %s220_s27, %s46_s30  ;;  %p240_p13 = scmp.ne.s32.totalorder %s2006_s12, %s2002_s11 }
  0x21   : > { %p222_p11 = scmp.eq.s32.totalorder %s221_s10, 0  ;;  %p2194_p12 = por %p235_p9, %p234_p8 }
  0x22   : > { %s2199_s23 = scalar_select %p47_p10, %s2022_s16, %s49_s25  }
  0x23   : > { %s2804_s14 = scalar_select %p2194_p12, 1, 0 }
  0x24   : > { %s2202_s18 = scalar_select %p222_p11, %s2010_s13, %s224_s28  }
  0x25   : > { %p241_p0 = scmp.eq.s32.totalorder %s1498_s22, 3  ;;  %p1654_p1 = scmp.lt.s32.totalorder %s2042_s20, 4 }
  0x26   : > { %s310_s21 = sand.u32 1, %s2022_s16   ;;  %s1545_s30 = sshll.u32 %s2038_s19, 10 }
  0x27   : > { %p2207_p2 = por %p241_p0, %p240_p13  ;;  %s1501_s27 = sshll.u32 %s310_s21, 6 }
  0x28   : > { %s2806_s0 = sld [smem:[#allocation18_spill]]  ;;  %s314_s25 = scalar_lea.vmem [#allocation5], %s1501_s27 }
  0x29   : > { %s2805_s8 = scalar_select %p2207_p2, 1, 0 }
  0x2a   : > { %s321_s28 = sshll.u32 %s314_s25, 4  ;;  %p2222_p4 = pnand %p1654_p1, %p2176_p3  ;;  %s2218_s28 = int_to_ptr.vmem [resolvable:$true] %s321_s28 }
  0x2b   : > { %s2227_s19 = scalar_lea.sflag [#allocation6], %s310_s21 }
  0x2c   : > { %p1860_p8 = pneg %p2222_p4 }
  0x2e   : > { %s2216_s9 = scalar_lea.hbm %s2806_s0, %s1545_s30  ;;  %s1863_s26 = scalar_lea.hbm %s2806_s0, 2048 }
  0x2f   : > { %s1858_s24 = scalar_lea.hbm %s2216_s9, 1024  ;;  %p1864_p3 = scmp.lt.u32.totalorder %s2216_s9, %s2806_s0 }
  0x30   : > { %p1859_p6 = scmp.ne.s32.totalorder %s2216_s9, %s1858_s24  ;;  %p1865_p11 = scmp.lt.u32.totalorder %s1863_s26, %s1858_s24 }
  0x31   : > { %p1867_p0 = scmp.lt.u32.totalorder %s1858_s24, %s2216_s9 }
  0x32   : > { %p1861_p9 = pnand %p1860_p8, %p1859_p6  ;;  %p1866_p13 = por %p1865_p11, %p1864_p3 }
  0x34   : > { %p1862_p10 = pneg %p1861_p9  ;;  %p1868_p1 = por %p1867_p0, %p1866_p13 }
  0x36   : > { %p1869_p5 = pnand %p1868_p1, %p1862_p10 }
  0x38   : > { %1872 = shalt.err (!%p1869_p5)
}
  0x39   : > { %s1873_s21 = scalar_lea.vmem %s2218_s28, 1024  ;;  %s2044_s27 = smov [#allocation5]  }
  0x3a   : > { %p1874_p6 = scmp.ne.s32.totalorder %s2218_s28, %s1873_s21  ;;  %s1878_s30 = sshll.u32 %s2044_s27, 4  ;;  %s1879_s30 = int_to_ptr.vmem [resolvable:$false] %s1878_s30 }
  0x3b   : > { %s1880_s10 = scalar_lea.vmem %s1879_s30, 2048  ;;  %p1881_p12 = scmp.lt.s32.totalorder %s2218_s28, %s1879_s30 }
  0x3c   : > { %p1876_p9 = pnand %p1874_p6, %p1860_p8  ;;  %p1882_p3 = scmp.lt.s32.totalorder %s1880_s10, %s1873_s21 }
  0x3e   : > { %p1877_p2 = pneg %p1876_p9  ;;  %p1883_p11 = por %p1882_p3, %p1881_p12 }
  0x40   : > { %p1884_p13 = pnand %p1883_p11, %p1877_p2 }
  0x42   : > { %1887 = shalt.err (!%p1884_p13)
}
  0x43   : > { %s2045_s24 = smov 256   ;;  %s2046_s26 = smov 16  }
  0x44   : > { %1646 = dma.hbm_to_vmem [thread:$0]  (!%p2222_p4), %s2216_s9, 1024, %s2218_s28, %s2227_s19, %s2045_s24, %s2045_s24, %s2046_s26  }
  0x45   : > { %p329_p5 = scmp.lt.s32.totalorder %s2042_s20, 5  ;;  %p2808_p8 = scmp.ge.s32.totalorder %s2042_s20, 1 }
  0x47   : > { %p330_p10 = pnand %p2808_p8, %p329_p5 }
  0x48   : > { %s335_s25 = sand.u32 (!%p330_p10), 1, %s2018_s15  }
  0x49   : > { %333 = sbr.rel (%p330_p10) target bundleno = 1513 (0x5e9), region = 52  ;;  %s1505_s21 = sshll.u32 (!%p330_p10), %s335_s25, 6 }
  0x4a   : > { %s336_s27 = scalar_lea.sflag (!%p330_p10), [#allocation6], %s335_s25  ;;  %s2259_s30 = scalar_lea.vmem (!%p330_p10), [#allocation5], %s1505_s21 }
  0x50   : > { %1989 = dma.done.wait (%p2186_p7), %s336_s27, 1024  }
  0x51   : > { %1991 = vsyncadd (%p2186_p7), %s336_s27, 4294966272  ;;  %s2266_s10 = sand.u32 1, %s2006_s12   ;;  %p1508_p12 = scmp.ne.s32.totalorder %s2026_s17, 0 }
  0x52   : > { %s1506_s9 = sshll.u32 %s2266_s10, 5  ;;  %s1507_s19 = sshll.u32 %s2266_s10, 8  ;;  %v385_v0 = vld [vmem:[%s2259_s30 + $0x8] sm:$0xff] (!%p1508_p12)  ;;  %v387_v1 = vld [vmem:[%s2259_s30 + $0x18] sm:$0xff] (!%p1508_p12)  ;;  %v384_v2 = vld [vmem:[%s2259_s30] sm:$0xff] (!%p1508_p12)  ;;  %v2047_v7 = vmov (!%p1508_p12), 0.0  }
  0x53   : > { %s2270_s28 = scalar_lea.vmem [#allocation8], %s1506_s9  ;;  %s2272_s22 = scalar_lea.vmem [#allocation9], %s1507_s19  ;;  %v1563_v3 = vpack.c.bf16 (!%p1508_p12), %v387_v1, %v385_v0  ;;  %v386_v4 = vld [vmem:[%s2259_s30 + $0x10] sm:$0xff] (!%p1508_p12)  ;;  %v389_v5 = vld [vmem:[%s2259_s30 + $0x28] sm:$0xff] (!%p1508_p12)  ;;  %v391_v6 = vld [vmem:[%s2259_s30 + $0x38] sm:$0xff] (!%p1508_p12)  ;;  %467 = vmatprep.mubr.f32.mxu0 (!%p1508_p12), %v2047_v7  ;;  %584 = vmatprep.mubr.f32.mxu1 (!%p1508_p12), %v2047_v7  ;;  %v2048_v12 = vmov (!%p1508_p12), 0  }
  0x54   : > { %383 = sbr.rel (%p1508_p12) target bundleno = 317 (0x13d), region = 60  ;;  %v1565_v8 = vpack.c.bf16 (!%p1508_p12), %v386_v4, %v384_v2  ;;  %v1567_v9 = vpack.c.bf16 (!%p1508_p12), %v391_v6, %v389_v5  ;;  %v388_v10 = vld [vmem:[%s2259_s30 + $0x20] sm:$0xff] (!%p1508_p12)  ;;  %v390_v11 = vld [vmem:[%s2259_s30 + $0x30] sm:$0xff] (!%p1508_p12)  ;;  %1756 = vset.pattern.permute.xlu0 (!%p1508_p12), %v2048_v12  ;;  %1757 = vset.pattern.permute.xlu1 (!%p1508_p12), %v2048_v12  ;;  %v393_v14 = vld [vmem:[%s2779_s4] sm:$0xf] (!%p1508_p12)  ;;  %s2809_s3 = sld [smem:[#allocation21_spill]] (!%p1508_p12) }
  0x55   : > { %1564 = vmatprep.subr.bf16.mxu0 (!%p1508_p12), %v1563_v3  ;;  %1617 = vmatprep.subr.bf16.mxu1 (!%p1508_p12), %v1563_v3  ;;  %v1569_v13 = vpack.c.bf16 (!%p1508_p12), %v390_v11, %v388_v10  ;;  %v479_v15 = vld [vmem:[%s2781_s6 + $0x8] sm:$0xff] (!%p1508_p12)  ;;  %v478_v16 = vld [vmem:[%s2781_s6] sm:$0xff] (!%p1508_p12)  ;;  %v480_v17 = vld [vmem:[%s2781_s6 + $0x10] sm:$0xff] (!%p1508_p12)  ;;  %vm399_vm0 = vcmask (!%p1508_p12), 261120  }
  0x56   : > { %1566 = vmatpush1.bf16.msra.mxu0 (!%p1508_p12), %v1565_v8  ;;  %1619 = vmatpush1.bf16.msra.mxu1 (!%p1508_p12), %v1565_v8  ;;  %v475_v19 = vld [vmem:[%s2780_s5 + $0x8] sm:$0xff] (!%p1508_p12)  ;;  %v481_v20 = vld [vmem:[%s2781_s6 + $0x18] sm:$0xff] (!%p1508_p12)  ;;  %v476_v21 = vld [vmem:[%s2780_s5 + $0x10] sm:$0xff] (!%p1508_p12) }
  0x57   : > { %1568 = vmatprep.subr.bf16.mxu0 (!%p1508_p12), %v1567_v9  ;;  %1618 = vmatprep.subr.bf16.mxu1 (!%p1508_p12), %v1567_v9  ;;  %v474_v22 = vld [vmem:[%s2780_s5] sm:$0xff] (!%p1508_p12)  ;;  %v477_v23 = vld [vmem:[%s2780_s5 + $0x18] sm:$0xff] (!%p1508_p12) }
  0x58   : > { %396 = vperm.xlu0 (!%p1508_p12), %1756, %v393_v14   ;;  %489 = vperm.xlu1 (!%p1508_p12), %1757, %v479_v15  }
  0x5a   : > { %1570 = vmatpush1.bf16.msra.mxu0 (!%p1508_p12), %v1569_v13  ;;  %1620 = vmatpush1.bf16.msra.mxu1 (!%p1508_p12), %v1569_v13  ;;  %v392_v18 = vld [vmem:[%s2809_s3] sm:$0xf] (!%p1508_p12) }
  0x5b   : > { %1572 = vmatprep.subr.bf16.mxu0 %v1563_v3 }
  0x5c   : > { %484 = vperm.xlu0 %1756, %v478_v16   ;;  %494 = vperm.xlu1 %1757, %v480_v17  }
  0x5d   : > { %1509 = vmatmul.mubr.msk.f32.vlgmr.msra.gmra.mrb[0].mxu0 %vm399_vm0, %v392_v18  ;;  %1511 = vmatmul.mubr.msk.f32.vlgmr.msra.gmra.mrb[0].mxu1 %vm399_vm0, %v475_v19 }
  0x5e   : > { %1574 = vmatpush1.bf16.msra.mxu0 %v1565_v8  ;;  %590 = vmatprep.mubr.f32.mxu1 %v2047_v7 }
  0x5f   : > { %1576 = vmatprep.subr.bf16.mxu0 %v1567_v9  ;;  %578 = vmatprep.mubr.f32.mxu0 %v2047_v7 }
  0x60   : > { %499 = vperm.xlu0 %1756, %v481_v20  }
  0x61   : > { %1512 = vmatmul.mubr.msk.f32.gmra.mrb[2].mxu1 %vm399_vm0, %v476_v21 }
  0x62   : > { %1578 = vmatpush1.bf16.msra.mxu0 %v1569_v13  ;;  %596 = vmatprep.mubr.f32.mxu1 %v2047_v7 }
  0x65   : > { %1510 = vmatmul.mubr.msk.f32.vlgmr.msra.gmra.mrb[2].mxu0 %vm399_vm0, %v474_v22  ;;  %1513 = vmatmul.mubr.msk.f32.gmra.mrb[4].mxu1 %vm399_vm0, %v477_v23 }
  0xd7   : > { %v397_v24 = vpop.permute.xlu0 %396  ;;  %v490_v25 = vpop.permute.xlu1 %489 }
  0xdb   : > { %v485_v26 = vpop.permute.xlu0 %484  ;;  %v495_v35 = vpop.permute.xlu1 %494 }
  0xdf   : > { %v500_v41 = vpop.permute.xlu0 %499 }
 0x130   : > { %v469_v27 = vpop.f32.mrb[0].mxu0  ;;  %v586_v28 = vpop.f32.mrb[0].mxu1 }
 0x131   : > { %v470_v29 = vadd.f32 %v469_v27, %v397_v24  ;;  %v587_v30 = vadd.f32 %v586_v28, %v490_v25  ;;  %v471_v31 = vpop.f32.mrb[1].mxu0  ;;  %v588_v32 = vpop.f32.mrb[1].mxu1 }
 0x132   : > { %v472_v33 = vadd.f32 %v471_v31, %v397_v24  ;;  %v589_v34 = vadd.f32 %v588_v32, %v490_v25 }
 0x133   : > { %610 = vst [vmem:[#allocation3 + $0x10] sm:$0xff] %v587_v30 }
 0x134   : > { %v605_v36 = vcombine.low %v470_v29, %v472_v33  ;;  %611 = vst [vmem:[#allocation3 + $0x18] sm:$0xff] %v589_v34  ;;  %v592_v37 = vpop.f32.mrb[2].mxu1 }
 0x135   : > { %v593_v38 = vadd.f32 %v592_v37, %v495_v35  ;;  %v594_v39 = vpop.f32.mrb[3].mxu1 }
 0x136   : > { %607 = vst [vmem:[#allocation2] sm:$0xff] %v605_v36  ;;  %v595_v40 = vadd.f32 %v594_v39, %v495_v35 }
 0x137   : > { %612 = vst [vmem:[#allocation3 + $0x20] sm:$0xff] %v593_v38 }
 0x138   : > { %613 = vst [vmem:[#allocation3 + $0x28] sm:$0xff] %v595_v40  ;;  %v580_v42 = vpop.f32.mrb[2].mxu0  ;;  %v598_v43 = vpop.f32.mrb[4].mxu1 }
 0x139   : > { %v581_v44 = vadd.f32 %v580_v42, %v485_v26  ;;  %v599_v45 = vadd.f32 %v598_v43, %v500_v41  ;;  %v582_v46 = vpop.f32.mrb[3].mxu0  ;;  %v600_v47 = vpop.f32.mrb[5].mxu1 }
 0x13a   : > { %v583_v48 = vadd.f32 %v582_v46, %v485_v26  ;;  %v601_v49 = vadd.f32 %v600_v47, %v500_v41 }
 0x13b   : > { %608 = vst [vmem:[#allocation3] sm:$0xff] %v581_v44  ;;  %614 = vst [vmem:[#allocation3 + $0x30] sm:$0xff] %v599_v45 }
 0x13c   : > { %609 = vst [vmem:[#allocation3 + $0x8] sm:$0xff] %v583_v48  ;;  %615 = vst [vmem:[#allocation3 + $0x38] sm:$0xff] %v601_v49 }
 0x13d PF: > { %s1514_s26 = sshll.u32 %s2026_s17, 7  ;;  %v2049_v50 = vmov 0.0|0.0   ;;  %vm2050_vm1 = vmmov 0   ;;  %v2051_v51 = vmov 0.0   ;;  %s2810_s2 = sld [smem:[#allocation20_spill]]  ;;  %v2052_v53 = vmov 0  }
 0x13e   : > { %1579 = vmatprep.subr.bf16.mxu0 %v2049_v50  ;;  %s617_s25 = sshra.s32 %s1514_s26, 7  ;;  %1560 = vmatprep.mubr.msk.f32.mxu0 %vm2050_vm1, %v2051_v51  ;;  %s2811_s1 = sld [smem:[#allocation19_spill]]  ;;  %vm632_vm2 = vcmask 261120   ;;  %v706_v61 = vld [vmem:[#allocation2] sm:$0xff]  ;;  %vm790_vm3 = vcmask 1043456   ;;  %vm741_vm4 = vcmask 31744  }
 0x13f   : > { %s1515_s9 = sshll.u32 %s617_s25, 3  ;;  %1758 = vset.pattern.permute.xlu0 %v2052_v53  ;;  %859 = vmatprep.mubr.f32.mxu1 %v2051_v51  ;;  %v740_v62 = vcombine.high %v706_v61, %v706_v61  ;;  %s1546_s29 = sshll.u32 %s2026_s17, 5 }
 0x140   : > { %s2325_s0 = scalar_lea.vmem %s2259_s30, %s1515_s9 [#allocation5]  ;;  %s1541_s24 = sshll.u32 %s2030_s7, 6 }
 0x141   : > { %v2328_v54 = vld [vmem:[%s2325_s0] sm:$0xff]  ;;  %v2331_v55 = vld [vmem:[%s2325_s0 + $0x10] sm:$0xff]  ;;  %1517 = vmatprep.subr.msk.mxu1 %vm790_vm3, %v740_v62  ;;  %s1371_s26 = sadd.s32 %s1546_s29, %s1541_s24  ;;  %s1374_s21 = sshll.u32 %s2272_s22, 4  ;;  %s2667_s21 = int_to_ptr.vmem [resolvable:$true] %s1374_s21 }
 0x142   : > { %v623_v56 = vld [vmem:[%s2325_s0 + $0x20] sm:$0xff]  ;;  %v1580_v57 = vpack.c.bf16 %v2331_v55, %v2328_v54  ;;  %v624_v58 = vld [vmem:[%s2325_s0 + $0x30] sm:$0xff]  ;;  %1518 = vmatpush1.msk.msra.mxu1 %vm790_vm3, %v706_v61  ;;  %s1542_s25 = sshll.u32 %s1371_s26, 7  ;;  %s2812_s30 = sld [smem:[#allocation23_spill]] }
 0x143   : > { %v626_v52 = vld [vmem:[%s2810_s2] sm:$0xf]  ;;  %v1583_v59 = vpack.c.bf16 %v624_v58, %v623_v56  ;;  %s1888_s2 = scalar_lea.vmem %s2667_s21, 4096  ;;  %p2813_p2 = scmp.ne.s32.totalorder %s2804_s14, 0 }
 0x144   : > { %629 = vperm.xlu0 %1758, %v626_v52   ;;  %1581 = vmatpush3.bf16.msra.mxu0 %v1580_v57  ;;  %v625_v60 = vld [vmem:[%s2811_s1] sm:$0xf]  ;;  %s1341_s1 = scalar_lea.sflag [#allocation10], %s2266_s10  ;;  %p1889_p7 = scmp.ne.s32.totalorder %s2667_s21, %s1888_s2 }
 0x145   : > { %1582 = vmatprep.subr.bf16.mxu0 %v2049_v50  ;;  %s2053_s3 = smov [#allocation9]  }
 0x146   : > { %p1890_p4 = pnand %p1889_p7, %p2813_p2  ;;  %s1892_s29 = sshll.u32 %s2053_s3, 4  ;;  %s1893_s29 = int_to_ptr.vmem [resolvable:$false] %s1892_s29 }
 0x147   : > { %p1895_p1 = scmp.lt.s32.totalorder %s2667_s21, %s1893_s29 }
 0x148   : > { %1584 = vmatpush3.bf16.msra.mxu0 %v1583_v59  ;;  %s2665_s19 = scalar_lea.hbm %s2812_s30, %s1542_s25  ;;  %p1891_p0 = pneg %p1890_p4 }
 0x14b   : > { %1561 = vmatmul.mubr.msk.f32.vlgmr.msra.gmra.mrb[0].mxu0 %vm632_vm2, %v625_v60 }
 0x1c3   : > { %v630_v63 = vpop.permute.xlu0 %629 }
 0x21e   : > { %v702_v0 = vpop.f32.mrb[0].mxu0 }
 0x21f   : > { %v703_v1 = vadd.f32 %v702_v0, %v630_v63  ;;  %v1562_v2 = vpop.f32.mrb[1].mxu0 }
 0x221   : > { %707 = vxpose.xlu0.b32.start.end [1/1] (short) %v703_v1, 128 }
 0x2a1   : > { %v723_v3 = vpop.trf.xlu0 }
 0x2a2   : > { %1519 = vmatmul.mubr.msk.f32.vlgmr.msra.gmra.mrb[0].mxu1 %vm741_vm4, %v723_v3 }
 0x2a3   : > { %865 = vmatprep.mubr.f32.mxu1 %v2051_v51 }
 0x2a5   : > { %v724_v4 = vpop.trf.xlu0 }
 0x2a6   : > { %1520 = vmatmul.mubr.msk.f32.gmra.mrb[2].mxu1 %vm741_vm4, %v724_v4 }
 0x2a7   : > { %871 = vmatprep.mubr.f32.mxu1 %v2051_v51 }
 0x2a9   : > { %v725_v5 = vpop.trf.xlu0 }
 0x2aa   : > { %1521 = vmatmul.mubr.msk.f32.gmra.mrb[4].mxu1 %vm741_vm4, %v725_v5 }
 0x2ab   : > { %877 = vmatprep.mubr.f32.mxu1 %v2051_v51 }
 0x2ad   : > { %v726_v6 = vpop.trf.xlu0 }
 0x2ae   : > { %1522 = vmatmul.mubr.msk.f32.gmra.mrb[6].mxu1 %vm741_vm4, %v726_v6 }
 0x2af   : > { %883 = vmatprep.mubr.f32.mxu1 %v2051_v51 }
 0x2b1   : > { %v727_v7 = vpop.trf.xlu0 }
 0x2b2   : > { %1523 = vmatmul.mubr.msk.f32.gmra.mrb[8].mxu1 %vm741_vm4, %v727_v7 }
 0x2b3   : > { %889 = vmatprep.mubr.f32.mxu1 %v2051_v51 }
 0x2b5   : > { %v728_v8 = vpop.trf.xlu0 }
 0x2b6   : > { %1524 = vmatmul.mubr.msk.f32.gmra.mrb[10].mxu1 %vm741_vm4, %v728_v8 }
 0x2b7   : > { %895 = vmatprep.mubr.f32.mxu1 %v2051_v51 }
 0x2b9   : > { %v729_v9 = vpop.trf.xlu0 }
 0x2ba   : > { %1525 = vmatmul.mubr.msk.f32.gmra.mrb[12].mxu1 %vm741_vm4, %v729_v9 }
 0x2bb   : > { %901 = vmatprep.mubr.f32.mxu1 %v2051_v51 }
 0x2bd   : > { %v730_v10 = vpop.trf.xlu0 }
 0x2be   : > { %1526 = vmatmul.mubr.msk.f32.gmra.mrb[14].mxu1 %vm741_vm4, %v730_v10 }
 0x2bf   : > { %907 = vmatprep.mubr.f32.mxu1 %v2051_v51 }
 0x2c1   : > { %v731_v11 = vpop.trf.xlu0 }
 0x2c2   : > { %1527 = vmatmul.mubr.msk.f32.gmra.mrb[16].mxu1 %vm741_vm4, %v731_v11 }
 0x2c3   : > { %913 = vmatprep.mubr.f32.mxu1 %v2051_v51 }
 0x2c5   : > { %v732_v12 = vpop.trf.xlu0 }
 0x2c6   : > { %1528 = vmatmul.mubr.msk.f32.gmra.mrb[18].mxu1 %vm741_vm4, %v732_v12 }
 0x2c7   : > { %919 = vmatprep.mubr.f32.mxu1 %v2051_v51 }
 0x2c9   : > { %v733_v13 = vpop.trf.xlu0 }
 0x2ca   : > { %1529 = vmatmul.mubr.msk.f32.gmra.mrb[20].mxu1 %vm741_vm4, %v733_v13 }
 0x2cb   : > { %925 = vmatprep.mubr.f32.mxu1 %v2051_v51 }
 0x2cd   : > { %v734_v14 = vpop.trf.xlu0 }
 0x2ce   : > { %1530 = vmatmul.mubr.msk.f32.gmra.mrb[22].mxu1 %vm741_vm4, %v734_v14 }
 0x2cf   : > { %931 = vmatprep.mubr.f32.mxu1 %v2051_v51 }
 0x2d1   : > { %v735_v15 = vpop.trf.xlu0 }
 0x2d2   : > { %1531 = vmatmul.mubr.msk.f32.gmra.mrb[24].mxu1 %vm741_vm4, %v735_v15 }
 0x2d3   : > { %937 = vmatprep.mubr.f32.mxu1 %v2051_v51 }
 0x2d5   : > { %v736_v16 = vpop.trf.xlu0 }
 0x2d6   : > { %1532 = vmatmul.mubr.msk.f32.gmra.mrb[26].mxu1 %vm741_vm4, %v736_v16 }
 0x2d7   : > { %943 = vmatprep.mubr.f32.mxu1 %v2051_v51 }
 0x2d9   : > { %v737_v17 = vpop.trf.xlu0 }
 0x2da   : > { %1533 = vmatmul.mubr.msk.f32.gmra.mrb[28].mxu1 %vm741_vm4, %v737_v17 }
 0x2db   : > { %949 = vmatprep.mubr.f32.mxu1 %v2051_v51 }
 0x2dd   : > { %v738_v18 = vpop.trf.xlu0 }
 0x2de   : > { %1534 = vmatmul.mubr.msk.f32.gmra.mrb[30].mxu1 %vm741_vm4, %v738_v18 }
 0x375   : > { %v2371_v19 = vpop.f32.mrb[0].mxu1 }
 0x376   : > { %v2373_v20 = vpop.f32.mrb[1].mxu1 }
 0x377   : > { %v956_v21 = vmax.f32 %v2371_v19, %v2373_v20 }
 0x379   : > { %957 = vmax.xlane.f32.xlu1 %v956_v21  ;;  %v2377_v22 = vpop.f32.mrb[2].mxu1 }
 0x37a   : > { %v2379_v23 = vpop.f32.mrb[3].mxu1 }
 0x37b   : > { %v959_v24 = vmax.f32 %v2377_v22, %v2379_v23 }
 0x37d   : > { %960 = vmax.xlane.f32.xlu1 %v959_v24  ;;  %v2383_v25 = vpop.f32.mrb[4].mxu1 }
 0x37e   : > { %v2385_v26 = vpop.f32.mrb[5].mxu1 }
 0x37f   : > { %v962_v27 = vmax.f32 %v2383_v25, %v2385_v26 }
 0x381   : > { %963 = vmax.xlane.f32.xlu1 %v962_v27  ;;  %v2389_v28 = vpop.f32.mrb[6].mxu1 }
 0x382   : > { %v2391_v29 = vpop.f32.mrb[7].mxu1 }
 0x383   : > { %v965_v30 = vmax.f32 %v2389_v28, %v2391_v29 }
 0x385   : > { %966 = vmax.xlane.f32.xlu1 %v965_v30  ;;  %v2395_v31 = vpop.f32.mrb[8].mxu1 }
 0x386   : > { %v2397_v32 = vpop.f32.mrb[9].mxu1 }
 0x387   : > { %v968_v33 = vmax.f32 %v2395_v31, %v2397_v32 }
 0x389   : > { %969 = vmax.xlane.f32.xlu1 %v968_v33  ;;  %v2401_v34 = vpop.f32.mrb[10].mxu1 }
 0x38a   : > { %v2403_v35 = vpop.f32.mrb[11].mxu1 }
 0x38b   : > { %v971_v36 = vmax.f32 %v2401_v34, %v2403_v35 }
 0x38d   : > { %972 = vmax.xlane.f32.xlu1 %v971_v36  ;;  %v2407_v37 = vpop.f32.mrb[12].mxu1 }
 0x38e   : > { %v2409_v38 = vpop.f32.mrb[13].mxu1 }
 0x38f   : > { %v974_v39 = vmax.f32 %v2407_v37, %v2409_v38 }
 0x391   : > { %975 = vmax.xlane.f32.xlu1 %v974_v39  ;;  %v2413_v40 = vpop.f32.mrb[14].mxu1 }
 0x392   : > { %v2415_v41 = vpop.f32.mrb[15].mxu1 }
 0x393   : > { %v977_v42 = vmax.f32 %v2413_v40, %v2415_v41 }
 0x395   : > { %978 = vmax.xlane.f32.xlu1 %v977_v42  ;;  %v2419_v43 = vpop.f32.mrb[16].mxu1 }
 0x396   : > { %v2421_v44 = vpop.f32.mrb[17].mxu1 }
 0x397   : > { %v980_v45 = vmax.f32 %v2419_v43, %v2421_v44 }
 0x399   : > { %981 = vmax.xlane.f32.xlu1 %v980_v45  ;;  %v2425_v46 = vpop.f32.mrb[18].mxu1 }
 0x39a   : > { %v2427_v47 = vpop.f32.mrb[19].mxu1 }
 0x39b   : > { %v983_v48 = vmax.f32 %v2425_v46, %v2427_v47 }
 0x39d   : > { %984 = vmax.xlane.f32.xlu0 %v983_v48  ;;  %v2431_v49 = vpop.f32.mrb[20].mxu1 }
 0x39e   : > { %v2433_v50 = vpop.f32.mrb[21].mxu1 }
 0x39f   : > { %v986_v51 = vmax.f32 %v2431_v49, %v2433_v50 }
 0x3a1   : > { %987 = vmax.xlane.f32.xlu1 %v986_v51  ;;  %v2437_v52 = vpop.f32.mrb[22].mxu1 }
 0x3a2   : > { %v2439_v53 = vpop.f32.mrb[23].mxu1 }
 0x3a3   : > { %v989_v56 = vmax.f32 %v2437_v52, %v2439_v53 }
 0x3a5   : > { %990 = vmax.xlane.f32.xlu1 %v989_v56  ;;  %v2443_v57 = vpop.f32.mrb[24].mxu1 }
 0x3a6   : > { %v2445_v58 = vpop.f32.mrb[25].mxu1 }
 0x3a7   : > { %v992_v59 = vmax.f32 %v2443_v57, %v2445_v58 }
 0x3a9   : > { %993 = vmax.xlane.f32.xlu1 %v992_v59  ;;  %v2449_v60 = vpop.f32.mrb[26].mxu1 }
 0x3aa   : > { %v2451_v61 = vpop.f32.mrb[27].mxu1 }
 0x3ab   : > { %v995_v62 = vmax.f32 %v2449_v60, %v2451_v61 }
 0x3ad   : > { %996 = vmax.xlane.f32.xlu1 %v995_v62  ;;  %v2455_v63 = vpop.f32.mrb[28].mxu1 }
 0x3ae   : > { %v2457_v0 = vpop.f32.mrb[29].mxu1 }
 0x3af   : > { %v998_v1 = vmax.f32 %v2455_v63, %v2457_v0 }
 0x3b1   : > { %999 = vmax.xlane.f32.xlu1 %v998_v1  ;;  %v2461_v2 = vpop.f32.mrb[30].mxu1 }
 0x3b2   : > { %v2463_v3 = vpop.f32.mrb[31].mxu1 }
 0x3b3   : > { %v1001_v4 = vmax.f32 %v2461_v2, %v2463_v3 }
 0x3b5   : > { %1002 = vmax.xlane.f32.xlu1 %v1001_v4 }
 0x406   : > { %v958_v5 = vpop.xlane.xlu1 %957 }
 0x407   : > { %v1004_v6 = vsub.f32 %v2371_v19, %v958_v5  ;;  %v1005_v7 = vsub.f32 %v2373_v20, %v958_v5 }
 0x409   : > { %v1036_v8 = vmul.f32 1.442695, %v1004_v6  ;;  %v1038_v9 = vmul.f32 1.442695, %v1005_v7 }
 0x40a   : > { %v961_v10 = vpop.xlane.xlu1 %960 }
 0x40b   : > { %1760 = vpow2.f32 %v1036_v8  ;;  %v1006_v11 = vsub.f32 %v2377_v22, %v961_v10  ;;  %v1007_v12 = vsub.f32 %v2379_v23, %v961_v10 }
 0x40c   : > { %1762 = vpow2.f32 %v1038_v9 }
 0x40d   : > { %v1040_v13 = vmul.f32 1.442695, %v1006_v11  ;;  %v1042_v14 = vmul.f32 1.442695, %v1007_v12 }
 0x40e   : > { %v964_v15 = vpop.xlane.xlu1 %963 }
 0x40f   : > { %1764 = vpow2.f32 %v1040_v13  ;;  %v1008_v16 = vsub.f32 %v2383_v25, %v964_v15  ;;  %v1009_v17 = vsub.f32 %v2385_v26, %v964_v15 }
 0x410   : > { %1766 = vpow2.f32 %v1042_v14 }
 0x411   : > { %v1044_v18 = vmul.f32 1.442695, %v1008_v16  ;;  %v1046_v19 = vmul.f32 1.442695, %v1009_v17 }
 0x412   : > { %v967_v20 = vpop.xlane.xlu1 %966 }
 0x413   : > { %1768 = vpow2.f32 %v1044_v18  ;;  %v1010_v21 = vsub.f32 %v2389_v28, %v967_v20  ;;  %v1011_v22 = vsub.f32 %v2391_v29, %v967_v20 }
 0x414   : > { %1770 = vpow2.f32 %v1046_v19 }
 0x415   : > { %v2475_v23 = vpop.eup %1760  ;;  %v1048_v24 = vmul.f32 1.442695, %v1010_v21  ;;  %v1050_v27 = vmul.f32 1.442695, %v1011_v22 }
 0x416   : > { %v2477_v30 = vpop.eup %1762  ;;  %v970_v33 = vpop.xlane.xlu1 %969 }
 0x417   : > { %1772 = vpow2.f32 %v1048_v24  ;;  %v1012_v25 = vsub.f32 %v2395_v31, %v970_v33  ;;  %v1013_v26 = vsub.f32 %v2397_v32, %v970_v33  ;;  %v1100_v36 = vadd.f32 %v2477_v30, %v2475_v23 }
 0x418   : > { %1774 = vpow2.f32 %v1050_v27 }
 0x419   : > { %v2483_v28 = vpop.eup %1764  ;;  %v1052_v29 = vmul.f32 1.442695, %v1012_v25  ;;  %v1054_v39 = vmul.f32 1.442695, %v1013_v26  ;;  %1101 = vadd.xlane.f32.xlu1 %v1100_v36 }
 0x41a   : > { %v2485_v42 = vpop.eup %1766  ;;  %v973_v45 = vpop.xlane.xlu1 %972 }
 0x41b   : > { %1776 = vpow2.f32 %v1052_v29  ;;  %v1014_v48 = vsub.f32 %v2401_v34, %v973_v45  ;;  %v1015_v51 = vsub.f32 %v2403_v35, %v973_v45  ;;  %v1103_v31 = vadd.f32 %v2485_v42, %v2483_v28 }
 0x41c   : > { %1778 = vpow2.f32 %v1054_v39 }
 0x41d   : > { %v2491_v32 = vpop.eup %1768  ;;  %v1056_v56 = vmul.f32 1.442695, %v1014_v48  ;;  %v1058_v59 = vmul.f32 1.442695, %v1015_v51  ;;  %1104 = vadd.xlane.f32.xlu1 %v1103_v31 }
 0x41e   : > { %v2493_v62 = vpop.eup %1770  ;;  %v976_v1 = vpop.xlane.xlu1 %975 }
 0x41f   : > { %1780 = vpow2.f32 %v1056_v56  ;;  %v1016_v4 = vsub.f32 %v2407_v37, %v976_v1  ;;  %v1017_v5 = vsub.f32 %v2409_v38, %v976_v1  ;;  %v1106_v34 = vadd.f32 %v2493_v62, %v2491_v32 }
 0x420   : > { %1782 = vpow2.f32 %v1058_v59 }
 0x421   : > { %v2499_v35 = vpop.eup %1772  ;;  %v1060_v6 = vmul.f32 1.442695, %v1016_v4  ;;  %v1062_v7 = vmul.f32 1.442695, %v1017_v5  ;;  %1107 = vadd.xlane.f32.xlu1 %v1106_v34 }
 0x422   : > { %v2501_v8 = vpop.eup %1774  ;;  %v979_v9 = vpop.xlane.xlu1 %978 }
 0x423   : > { %1784 = vpow2.f32 %v1060_v6  ;;  %v1018_v10 = vsub.f32 %v2413_v40, %v979_v9  ;;  %v1019_v11 = vsub.f32 %v2415_v41, %v979_v9  ;;  %v1109_v37 = vadd.f32 %v2501_v8, %v2499_v35 }
 0x424   : > { %1786 = vpow2.f32 %v1062_v7 }
 0x425   : > { %v2507_v38 = vpop.eup %1776  ;;  %v1064_v12 = vmul.f32 1.442695, %v1018_v10  ;;  %v1066_v13 = vmul.f32 1.442695, %v1019_v11  ;;  %1110 = vadd.xlane.f32.xlu1 %v1109_v37 }
 0x426   : > { %v2509_v14 = vpop.eup %1778  ;;  %v982_v15 = vpop.xlane.xlu1 %981 }
 0x427   : > { %1788 = vpow2.f32 %v1064_v12  ;;  %v1020_v16 = vsub.f32 %v2419_v43, %v982_v15  ;;  %v1021_v17 = vsub.f32 %v2421_v44, %v982_v15  ;;  %v1112_v40 = vadd.f32 %v2509_v14, %v2507_v38 }
 0x428   : > { %1790 = vpow2.f32 %v1066_v13 }
 0x429   : > { %v2515_v41 = vpop.eup %1780  ;;  %v1068_v18 = vmul.f32 1.442695, %v1020_v16  ;;  %v1070_v19 = vmul.f32 1.442695, %v1021_v17  ;;  %1113 = vadd.xlane.f32.xlu1 %v1112_v40 }
 0x42a   : > { %v2517_v20 = vpop.eup %1782  ;;  %v985_v21 = vpop.xlane.xlu0 %984 }
 0x42b   : > { %1792 = vpow2.f32 %v1068_v18  ;;  %v1022_v22 = vsub.f32 %v2425_v46, %v985_v21  ;;  %v1023_v24 = vsub.f32 %v2427_v47, %v985_v21  ;;  %v1115_v43 = vadd.f32 %v2517_v20, %v2515_v41 }
 0x42c   : > { %1794 = vpow2.f32 %v1070_v19 }
 0x42d   : > { %v2523_v44 = vpop.eup %1784  ;;  %v1072_v27 = vmul.f32 1.442695, %v1022_v22  ;;  %v1074_v33 = vmul.f32 1.442695, %v1023_v24  ;;  %1116 = vadd.xlane.f32.xlu1 %v1115_v43 }
 0x42e   : > { %v2525_v25 = vpop.eup %1786  ;;  %v988_v26 = vpop.xlane.xlu1 %987 }
 0x42f   : > { %1796 = vpow2.f32 %v1072_v27  ;;  %v1024_v36 = vsub.f32 %v2431_v49, %v988_v26  ;;  %v1025_v29 = vsub.f32 %v2433_v50, %v988_v26  ;;  %v1118_v46 = vadd.f32 %v2525_v25, %v2523_v44 }
 0x430   : > { %1798 = vpow2.f32 %v1074_v33 }
 0x431   : > { %v2531_v47 = vpop.eup %1788  ;;  %v1076_v39 = vmul.f32 1.442695, %v1024_v36  ;;  %v1078_v45 = vmul.f32 1.442695, %v1025_v29  ;;  %1119 = vadd.xlane.f32.xlu1 %v1118_v46 }
 0x432   : > { %v2533_v48 = vpop.eup %1790  ;;  %v991_v51 = vpop.xlane.xlu1 %990 }
 0x433   : > { %1800 = vpow2.f32 %v1076_v39  ;;  %v1026_v31 = vsub.f32 %v2437_v52, %v991_v51  ;;  %v1027_v56 = vsub.f32 %v2439_v53, %v991_v51  ;;  %v1121_v49 = vadd.f32 %v2533_v48, %v2531_v47 }
 0x434   : > { %1802 = vpow2.f32 %v1078_v45 }
 0x435   : > { %v2539_v50 = vpop.eup %1792  ;;  %v1080_v59 = vmul.f32 1.442695, %v1026_v31  ;;  %v1082_v1 = vmul.f32 1.442695, %v1027_v56  ;;  %1122 = vadd.xlane.f32.xlu1 %v1121_v49 }
 0x436   : > { %v2541_v4 = vpop.eup %1794  ;;  %v994_v5 = vpop.xlane.xlu1 %993 }
 0x437   : > { %1804 = vpow2.f32 %v1080_v59  ;;  %v1028_v34 = vsub.f32 %v2443_v57, %v994_v5  ;;  %v1029_v6 = vsub.f32 %v2445_v58, %v994_v5  ;;  %v1124_v52 = vadd.f32 %v2541_v4, %v2539_v50  ;;  %v1231_v59 = vld [vmem:[#allocation3 + $0x18] sm:$0xff] }
 0x438   : > { %1806 = vpow2.f32 %v1082_v1  ;;  %1305 = vmatprep.mubr.f32.mxu1 %v1231_v59  ;;  %v1229_v1 = vld [vmem:[#allocation3 + $0x8] sm:$0xff] }
 0x439   : > { %v2547_v53 = vpop.eup %1796  ;;  %v1084_v7 = vmul.f32 1.442695, %v1028_v34  ;;  %v1086_v9 = vmul.f32 1.442695, %v1029_v6  ;;  %1125 = vadd.xlane.f32.xlu1 %v1124_v52  ;;  %1300 = vmatprep.mubr.f32.mxu0 %v1229_v1 }
 0x43a   : > { %v2549_v10 = vpop.eup %1798  ;;  %v997_v11 = vpop.xlane.xlu1 %996 }
 0x43b   : > { %1808 = vpow2.f32 %v1084_v7  ;;  %v1030_v37 = vsub.f32 %v2449_v60, %v997_v11  ;;  %v1031_v12 = vsub.f32 %v2451_v61, %v997_v11  ;;  %v1127_v57 = vadd.f32 %v2549_v10, %v2547_v53 }
 0x43c   : > { %1810 = vpow2.f32 %v1086_v9 }
 0x43d   : > { %v2555_v58 = vpop.eup %1800  ;;  %v1088_v13 = vmul.f32 1.442695, %v1030_v37  ;;  %v1090_v15 = vmul.f32 1.442695, %v1031_v12  ;;  %1128 = vadd.xlane.f32.xlu1 %v1127_v57 }
 0x43e   : > { %v2557_v16 = vpop.eup %1802  ;;  %v1000_v17 = vpop.xlane.xlu1 %999 }
 0x43f   : > { %1812 = vpow2.f32 %v1088_v13  ;;  %v1032_v40 = vsub.f32 %v2455_v63, %v1000_v17  ;;  %v1033_v18 = vsub.f32 %v2457_v0, %v1000_v17  ;;  %v1130_v60 = vadd.f32 %v2557_v16, %v2555_v58 }
 0x440   : > { %1814 = vpow2.f32 %v1090_v15 }
 0x441   : > { %v2563_v61 = vpop.eup %1804  ;;  %v1092_v19 = vmul.f32 1.442695, %v1032_v40  ;;  %v1094_v21 = vmul.f32 1.442695, %v1033_v18  ;;  %1131 = vadd.xlane.f32.xlu1 %v1130_v60 }
 0x442   : > { %v2565_v22 = vpop.eup %1806  ;;  %v1003_v24 = vpop.xlane.xlu1 %1002 }
 0x443   : > { %1816 = vpow2.f32 %v1092_v19  ;;  %v1034_v43 = vsub.f32 %v2461_v2, %v1003_v24  ;;  %v1035_v27 = vsub.f32 %v2463_v3, %v1003_v24  ;;  %v1133_v63 = vadd.f32 %v2565_v22, %v2563_v61 }
 0x444   : > { %1818 = vpow2.f32 %v1094_v21 }
 0x445   : > { %v2571_v0 = vpop.eup %1808  ;;  %v1096_v33 = vmul.f32 1.442695, %v1034_v43  ;;  %v1098_v26 = vmul.f32 1.442695, %v1035_v27  ;;  %1134 = vadd.xlane.f32.xlu1 %v1133_v63 }
 0x446   : > { %v2573_v36 = vpop.eup %1810 }
 0x447   : > { %1820 = vpow2.f32 %v1096_v33  ;;  %v1136_v29 = vadd.f32 %v2573_v36, %v2571_v0 }
 0x448   : > { %1822 = vpow2.f32 %v1098_v26 }
 0x449   : > { %v2577_v46 = vpop.eup %1812  ;;  %1137 = vadd.xlane.f32.xlu1 %v1136_v29 }
 0x44a   : > { %v2579_v2 = vpop.eup %1814 }
 0x44b   : > { %v1139_v3 = vadd.f32 %v2579_v2, %v2577_v46 }
 0x44d   : > { %v2583_v39 = vpop.eup %1816  ;;  %1140 = vadd.xlane.f32.xlu1 %v1139_v3 }
 0x44e   : > { %v2585_v45 = vpop.eup %1818 }
 0x44f   : > { %v1142_v51 = vadd.f32 %v2585_v45, %v2583_v39 }
 0x451   : > { %v2589_v31 = vpop.eup %1820  ;;  %1143 = vadd.xlane.f32.xlu1 %v1142_v51 }
 0x452   : > { %v2591_v56 = vpop.eup %1822 }
 0x453   : > { %v1145_v49 = vadd.f32 %v2591_v56, %v2589_v31 }
 0x455   : > { %1146 = vadd.xlane.f32.xlu1 %v1145_v49 }
 0x4a6   : > { %v1102_v5 = vpop.xlane.xlu1 %1101 }
 0x4a7   : > { %1824 = vrcp.f32 %v1102_v5 }
 0x4aa   : > { %v1105_v34 = vpop.xlane.xlu1 %1104 }
 0x4ab   : > { %1826 = vrcp.f32 %v1105_v34 }
 0x4ae   : > { %v1108_v6 = vpop.xlane.xlu1 %1107 }
 0x4af   : > { %1828 = vrcp.f32 %v1108_v6 }
 0x4b1   : > { %v1825_v52 = vpop.eup %1824 }
 0x4b2   : > { %v1111_v7 = vpop.xlane.xlu1 %1110  ;;  %v1165_v9 = vmul.f32 %v1825_v52, %v2477_v30  ;;  %v1164_v11 = vmul.f32 %v1825_v52, %v2475_v23 }
 0x4b3   : > { %1830 = vrcp.f32 %v1111_v7 }
 0x4b4   : > { %1197 = vst [vmem:[%s2272_s22 + $0x8] sm:$0xff] %v1165_v9  ;;  %1196 = vst [vmem:[%s2272_s22] sm:$0xff] %v1164_v11 }
 0x4b5   : > { %v1827_v37 = vpop.eup %1826 }
 0x4b6   : > { %v1114_v12 = vpop.xlane.xlu1 %1113  ;;  %v1167_v57 = vmul.f32 %v1827_v37, %v2485_v42  ;;  %v1166_v13 = vmul.f32 %v1827_v37, %v2483_v28 }
 0x4b7   : > { %1832 = vrcp.f32 %v1114_v12 }
 0x4b8   : > { %1199 = vst [vmem:[%s2272_s22 + $0x18] sm:$0xff] %v1167_v57  ;;  %v1585_v15 = vpack.c.bf16 %v1167_v57, %v1165_v9  ;;  %1198 = vst [vmem:[%s2272_s22 + $0x10] sm:$0xff] %v1166_v13  ;;  %v1587_v17 = vpack.c.bf16 %v1166_v13, %v1164_v11 }
 0x4b9   : > { %v1829_v40 = vpop.eup %1828 }
 0x4ba   : > { %1586 = vmatprep.subr.bf16.mxu0 %v1585_v15  ;;  %1621 = vmatprep.subr.bf16.mxu1 %v1585_v15  ;;  %v1117_v23 = vpop.xlane.xlu1 %1116  ;;  %v1169_v30 = vmul.f32 %v1829_v40, %v2493_v62  ;;  %v1168_v18 = vmul.f32 %v1829_v40, %v2491_v32 }
 0x4bb   : > { %1834 = vrcp.f32 %v1117_v23  ;;  %1588 = vmatpush1.bf16.xpose.msra.mxu0 %v1587_v17  ;;  %1629 = vmatpush1.bf16.xpose.msra.mxu1 %v1587_v17 }
 0x4bc   : > { %1201 = vst [vmem:[%s2272_s22 + $0x28] sm:$0xff] %v1169_v30  ;;  %1200 = vst [vmem:[%s2272_s22 + $0x20] sm:$0xff] %v1168_v18 }
 0x4bd   : > { %v1831_v28 = vpop.eup %1830 }
 0x4be   : > { %v1120_v42 = vpop.xlane.xlu1 %1119  ;;  %v1171_v60 = vmul.f32 %v1831_v28, %v2501_v8  ;;  %v1170_v19 = vmul.f32 %v1831_v28, %v2499_v35 }
 0x4bf   : > { %1836 = vrcp.f32 %v1120_v42 }
 0x4c0   : > { %1203 = vst [vmem:[%s2272_s22 + $0x38] sm:$0xff] %v1171_v60  ;;  %v1589_v21 = vpack.c.bf16 %v1171_v60, %v1169_v30  ;;  %1202 = vst [vmem:[%s2272_s22 + $0x30] sm:$0xff] %v1170_v19  ;;  %v1591_v62 = vpack.c.bf16 %v1170_v19, %v1168_v18 }
 0x4c1   : > { %v1833_v24 = vpop.eup %1832 }
 0x4c2   : > { %1590 = vmatprep.subr.bf16.mxu0 %v1589_v21  ;;  %1622 = vmatprep.subr.bf16.mxu1 %v1589_v21  ;;  %v1123_v32 = vpop.xlane.xlu1 %1122  ;;  %v1173_v43 = vmul.f32 %v1833_v24, %v2509_v14  ;;  %v1172_v27 = vmul.f32 %v1833_v24, %v2507_v38  ;;  %v1234_v24 = vld [vmem:[#allocation3 + $0x30] sm:$0xff] }
 0x4c3   : > { %1838 = vrcp.f32 %v1123_v32  ;;  %1592 = vmatpush1.bf16.xpose.msra.mxu0 %v1591_v62  ;;  %1630 = vmatpush1.bf16.xpose.msra.mxu1 %v1591_v62  ;;  %v1233_v62 = vld [vmem:[#allocation3 + $0x28] sm:$0xff] }
 0x4c4   : > { %1205 = vst [vmem:[%s2272_s22 + $0x48] sm:$0xff] %v1173_v43  ;;  %1204 = vst [vmem:[%s2272_s22 + $0x40] sm:$0xff] %v1172_v27 }
 0x4c5   : > { %v1835_v35 = vpop.eup %1834 }
 0x4c6   : > { %v1126_v8 = vpop.xlane.xlu1 %1125  ;;  %v1175_v63 = vmul.f32 %v1835_v35, %v2517_v20  ;;  %v1174_v33 = vmul.f32 %v1835_v35, %v2515_v41 }
 0x4c7   : > { %1840 = vrcp.f32 %v1126_v8 }
 0x4c8   : > { %1207 = vst [vmem:[%s2272_s22 + $0x58] sm:$0xff] %v1175_v63  ;;  %v1593_v26 = vpack.c.bf16 %v1175_v63, %v1173_v43  ;;  %1206 = vst [vmem:[%s2272_s22 + $0x50] sm:$0xff] %v1174_v33  ;;  %v1595_v14 = vpack.c.bf16 %v1174_v33, %v1172_v27 }
 0x4c9   : > { %v1837_v29 = vpop.eup %1836 }
 0x4ca   : > { %1594 = vmatprep.subr.bf16.mxu0 %v1593_v26  ;;  %1623 = vmatprep.subr.bf16.mxu1 %v1593_v26  ;;  %v1129_v38 = vpop.xlane.xlu1 %1128  ;;  %v1177_v3 = vmul.f32 %v1837_v29, %v2525_v25  ;;  %v1176_v51 = vmul.f32 %v1837_v29, %v2523_v44 }
 0x4cb   : > { %1842 = vrcp.f32 %v1129_v38  ;;  %1596 = vmatpush1.bf16.xpose.msra.mxu0 %v1595_v14  ;;  %1631 = vmatpush1.bf16.xpose.msra.mxu1 %v1595_v14 }
 0x4cc   : > { %1209 = vst [vmem:[%s2272_s22 + $0x68] sm:$0xff] %v1177_v3  ;;  %1208 = vst [vmem:[%s2272_s22 + $0x60] sm:$0xff] %v1176_v51 }
 0x4cd   : > { %v1839_v41 = vpop.eup %1838 }
 0x4ce   : > { %v1132_v20 = vpop.xlane.xlu1 %1131  ;;  %v1179_v49 = vmul.f32 %v1839_v41, %v2533_v48  ;;  %v1178_v59 = vmul.f32 %v1839_v41, %v2531_v47 }
 0x4cf   : > { %1844 = vrcp.f32 %v1132_v20 }
 0x4d0   : > { %1211 = vst [vmem:[%s2272_s22 + $0x78] sm:$0xff] %v1179_v49  ;;  %v1597_v1 = vpack.c.bf16 %v1179_v49, %v1177_v3  ;;  %1210 = vst [vmem:[%s2272_s22 + $0x70] sm:$0xff] %v1178_v59  ;;  %v1599_v25 = vpack.c.bf16 %v1178_v59, %v1176_v51 }
 0x4d1   : > { %v1841_v5 = vpop.eup %1840 }
 0x4d2   : > { %1598 = vmatprep.subr.bf16.mxu0 %v1597_v1  ;;  %1624 = vmatprep.subr.bf16.mxu1 %v1597_v1  ;;  %v1135_v44 = vpop.xlane.xlu1 %1134  ;;  %v1181_v34 = vmul.f32 %v1841_v5, %v2541_v4  ;;  %v1180_v6 = vmul.f32 %v1841_v5, %v2539_v50 }
 0x4d3   : > { %1846 = vrcp.f32 %v1135_v44  ;;  %1600 = vmatpush1.bf16.xpose.msra.mxu0 %v1599_v25  ;;  %1632 = vmatpush1.bf16.xpose.msra.mxu1 %v1599_v25 }
 0x4d4   : > { %1213 = vst [vmem:[%s2272_s22 + $0x88] sm:$0xff] %v1181_v34  ;;  %1212 = vst [vmem:[%s2272_s22 + $0x80] sm:$0xff] %v1180_v6 }
 0x4d5   : > { %v1843_v47 = vpop.eup %1842 }
 0x4d6   : > { %v1138_v48 = vpop.xlane.xlu1 %1137  ;;  %v1183_v52 = vmul.f32 %v1843_v47, %v2549_v10  ;;  %v1182_v7 = vmul.f32 %v1843_v47, %v2547_v53 }
 0x4d7   : > { %1848 = vrcp.f32 %v1138_v48 }
 0x4d8   : > { %1215 = vst [vmem:[%s2272_s22 + $0x98] sm:$0xff] %v1183_v52  ;;  %v1601_v9 = vpack.c.bf16 %v1183_v52, %v1181_v34  ;;  %1214 = vst [vmem:[%s2272_s22 + $0x90] sm:$0xff] %v1182_v7  ;;  %v1603_v4 = vpack.c.bf16 %v1182_v7, %v1180_v6 }
 0x4d9   : > { %v1845_v11 = vpop.eup %1844 }
 0x4da   : > { %1602 = vmatprep.subr.bf16.mxu0 %v1601_v9  ;;  %1625 = vmatprep.subr.bf16.mxu1 %v1601_v9  ;;  %v1141_v50 = vpop.xlane.xlu1 %1140  ;;  %v1185_v37 = vmul.f32 %v1845_v11, %v2557_v16  ;;  %v1184_v12 = vmul.f32 %v1845_v11, %v2555_v58 }
 0x4db   : > { %1850 = vrcp.f32 %v1141_v50  ;;  %1604 = vmatpush1.bf16.xpose.msra.mxu0 %v1603_v4  ;;  %1633 = vmatpush1.bf16.xpose.msra.mxu1 %v1603_v4 }
 0x4dc   : > { %1217 = vst [vmem:[%s2272_s22 + $0xa8] sm:$0xff] %v1185_v37  ;;  %1216 = vst [vmem:[%s2272_s22 + $0xa0] sm:$0xff] %v1184_v12 }
 0x4dd   : > { %v1847_v53 = vpop.eup %1846 }
 0x4de   : > { %v1144_v10 = vpop.xlane.xlu1 %1143  ;;  %v1187_v57 = vmul.f32 %v1847_v53, %v2565_v22  ;;  %v1186_v13 = vmul.f32 %v1847_v53, %v2563_v61 }
 0x4df   : > { %1852 = vrcp.f32 %v1144_v10 }
 0x4e0   : > { %1219 = vst [vmem:[%s2272_s22 + $0xb8] sm:$0xff] %v1187_v57  ;;  %v1605_v15 = vpack.c.bf16 %v1187_v57, %v1185_v37  ;;  %1218 = vst [vmem:[%s2272_s22 + $0xb0] sm:$0xff] %v1186_v13  ;;  %v1607_v16 = vpack.c.bf16 %v1186_v13, %v1184_v12 }
 0x4e1   : > { %v1849_v58 = vpop.eup %1848 }
 0x4e2   : > { %1606 = vmatprep.subr.bf16.mxu0 %v1605_v15  ;;  %1626 = vmatprep.subr.bf16.mxu1 %v1605_v15  ;;  %v1147_v17 = vpop.xlane.xlu1 %1146  ;;  %v1189_v40 = vmul.f32 %v1849_v58, %v2573_v36  ;;  %v1188_v23 = vmul.f32 %v1849_v58, %v2571_v0 }
 0x4e3   : > { %1854 = vrcp.f32 %v1147_v17  ;;  %1608 = vmatpush1.bf16.xpose.msra.mxu0 %v1607_v16  ;;  %1634 = vmatpush1.bf16.xpose.msra.mxu1 %v1607_v16 }
 0x4e4   : > { %1221 = vst [vmem:[%s2272_s22 + $0xc8] sm:$0xff] %v1189_v40  ;;  %1220 = vst [vmem:[%s2272_s22 + $0xc0] sm:$0xff] %v1188_v23 }
 0x4e5   : > { %v1851_v61 = vpop.eup %1850 }
 0x4e6   : > { %v1191_v22 = vmul.f32 %v1851_v61, %v2579_v2  ;;  %v1190_v30 = vmul.f32 %v1851_v61, %v2577_v46 }
 0x4e8   : > { %1223 = vst [vmem:[%s2272_s22 + $0xd8] sm:$0xff] %v1191_v22  ;;  %v1609_v18 = vpack.c.bf16 %v1191_v22, %v1189_v40  ;;  %1222 = vst [vmem:[%s2272_s22 + $0xd0] sm:$0xff] %v1190_v30  ;;  %v1611_v36 = vpack.c.bf16 %v1190_v30, %v1188_v23 }
 0x4e9   : > { %v1853_v28 = vpop.eup %1852 }
 0x4ea   : > { %1610 = vmatprep.subr.bf16.mxu0 %v1609_v18  ;;  %1627 = vmatprep.subr.bf16.mxu1 %v1609_v18  ;;  %v1193_v0 = vmul.f32 %v1853_v28, %v2585_v45  ;;  %v1192_v42 = vmul.f32 %v1853_v28, %v2583_v39  ;;  %v1230_v39 = vld [vmem:[#allocation3 + $0x10] sm:$0xff]  ;;  %v1228_v45 = vld [vmem:[#allocation3] sm:$0xff] }
 0x4eb   : > { %1612 = vmatpush1.bf16.xpose.msra.mxu0 %v1611_v36  ;;  %1635 = vmatpush1.bf16.xpose.msra.mxu1 %v1611_v36 }
 0x4ec   : > { %1225 = vst [vmem:[%s2272_s22 + $0xe8] sm:$0xff] %v1193_v0  ;;  %1224 = vst [vmem:[%s2272_s22 + $0xe0] sm:$0xff] %v1192_v42 }
 0x4ed   : > { %v1855_v2 = vpop.eup %1854 }
 0x4ee   : > { %v1195_v46 = vmul.f32 %v1855_v2, %v2591_v56  ;;  %v1194_v60 = vmul.f32 %v1855_v2, %v2589_v31  ;;  %v1232_v56 = vld [vmem:[#allocation3 + $0x20] sm:$0xff]  ;;  %v1235_v31 = vld [vmem:[#allocation3 + $0x38] sm:$0xff] }
 0x4f0   : > { %1227 = vst [vmem:[%s2272_s22 + $0xf8] sm:$0xff] %v1195_v46  ;;  %v1613_v19 = vpack.c.bf16 %v1195_v46, %v1193_v0  ;;  %1226 = vst [vmem:[%s2272_s22 + $0xf0] sm:$0xff] %v1194_v60  ;;  %v1615_v21 = vpack.c.bf16 %v1194_v60, %v1192_v42  ;;  %s1894_s22 = scalar_lea.vmem %s1893_s29, 8192 }
 0x4f1   : > { %p1896_p6 = scmp.lt.s32.totalorder %s1894_s22, %s1888_s2 }
 0x4f2   : > { %1614 = vmatprep.subr.bf16.mxu0 %v1613_v19  ;;  %1628 = vmatprep.subr.bf16.mxu1 %v1613_v19 }
 0x4f3   : > { %1616 = vmatpush1.bf16.xpose.msra.mxu0 %v1615_v21  ;;  %1636 = vmatpush1.bf16.xpose.msra.mxu1 %v1615_v21  ;;  %p1897_p9 = por %p1896_p6, %p1895_p1 }
 0x4f5   : > { %p1898_p3 = pnand %p1897_p9, %p1891_p0 }
 0x4fa   : > { %1306 = vmatmul.mubr.f32.vlgmr.msra.gmra.mrb[32].mxu1 %v1230_v39  ;;  %1301 = vmatmul.mubr.f32.vlgmr.msra.gmra.mrb[2].mxu0 %v1228_v45 }
 0x4fb   : > { %1310 = vmatprep.mubr.f32.mxu1 %v1233_v62 }
 0x4fe   : > { %1311 = vmatmul.mubr.f32.gmra.mrb[34].mxu1 %v1232_v56 }
 0x4ff   : > { %1315 = vmatprep.mubr.f32.mxu1 %v1235_v31 }
 0x502   : > { %1316 = vmatmul.mubr.f32.gmra.mrb[36].mxu1 %v1234_v24 }
 0x503   : > { %1901 = shalt.err (!%p1898_p3)
}
 0x504   : > { %s1902_s24 = scalar_lea.hbm %s2665_s19, 4096  ;;  %s1906_s3 = scalar_lea.hbm %s2812_s30, 16384 }
 0x505   : > { %p1903_p11 = scmp.ne.s32.totalorder %s2665_s19, %s1902_s24  ;;  %p1907_p8 = scmp.lt.u32.totalorder %s2665_s19, %s2812_s30 }
 0x506   : > { %p1908_p10 = scmp.lt.u32.totalorder %s1906_s3, %s1902_s24  ;;  %p1910_p7 = scmp.lt.u32.totalorder %s1902_s24, %s2665_s19 }
 0x507   : > { %p1904_p13 = pnand %p1903_p11, %p2813_p2 }
 0x508   : > { %p1909_p12 = por %p1908_p10, %p1907_p8 }
 0x509   : > { %p1905_p5 = pneg %p1904_p13 }
 0x50a   : > { %p1911_p4 = por %p1910_p7, %p1909_p12 }
 0x50c   : > { %p1912_p0 = pnand %p1911_p4, %p1905_p5 }
 0x50e   : > { %1915 = shalt.err (!%p1912_p0)
}
 0x50f   : > { %s2054_s2 = smov 256   ;;  %s2055_s29 = smov 16   ;;  %v1856_v51 = vld [vmem:[%s2325_s0 + $0x20] sm:$0xff] }
 0x510   : > { %1640 = dma.vmem_to_hbm [thread:$0]  (%p2813_p2), %s2667_s21, 4096, %s2665_s19, %s1341_s1, %s2054_s2, %s2054_s2, %s2055_s29  }
 0x511   : > { %s1321_s22 = sld [smem:[#allocation4]]  ;;  %s1537_s24 = sshll.u32 %s2030_s7, 3 }
 0x512   : > { %s1352_s1 = sadd.s32 %s2026_s17, %s1537_s24  ;;  %s1355_s19 = sshll.u32 %s2270_s28, 4  ;;  %s2709_s19 = int_to_ptr.vmem [resolvable:$true] %s1355_s19 }
 0x513   : > { %s1538_s21 = sshll.u32 %s1352_s1, 7  ;;  %s2814_s25 = sld [smem:[#allocation22_spill]] }
 0x514   : > { %s1336_s17 = scalar_lea.sflag [#allocation7], %s2266_s10  ;;  %s1916_s27 = scalar_lea.vmem %s2709_s19, 512 }
 0x515   : > { %p1917_p1 = scmp.ne.s32.totalorder %s2709_s19, %s1916_s27  ;;  %s2056_s9 = smov [#allocation8]  }
 0x516   : > { %s1920_s29 = sshll.u32 %s2056_s9, 4  ;;  %s1921_s29 = int_to_ptr.vmem [resolvable:$false] %s1920_s29 }
 0x517   : > { %v1322_v32 = vstv %s1321_s22  ;;  %p1918_p6 = pnand %p1917_p1, %p2813_p2  ;;  %s1922_s22 = scalar_lea.vmem %s1921_s29, 1024 }
 0x518   : > { %p1923_p3 = scmp.lt.s32.totalorder %s2709_s19, %s1921_s29  ;;  %p1924_p11 = scmp.lt.s32.totalorder %s1922_s22, %s1916_s27 }
 0x519   : > { %s2707_s3 = scalar_lea.hbm %s2814_s25, %s1538_s21  ;;  %p1919_p9 = pneg %p1918_p6 }
 0x51a   : > { %p1925_p13 = por %p1924_p11, %p1923_p3 }
 0x51c   : > { %p1926_p5 = pnand %p1925_p13, %p1919_p9 }
 0x5cd   : > { %v1307_v43 = vpop.f32.mrb[32].mxu1  ;;  %v1302_v27 = vpop.f32.mrb[2].mxu0 }
 0x5ce   : > { %v1324_v35 = vmul.f32 %v1322_v32, %v1307_v43  ;;  %v1309_v8 = vpop.f32.mrb[33].mxu1  ;;  %v1323_v63 = vmul.f32 %v1322_v32, %v1302_v27  ;;  %v1304_v33 = vpop.f32.mrb[3].mxu0 }
 0x5d0   : > { %v1328_v26 = vadd.f32 %v1324_v35, %v2331_v55  ;;  %v1327_v14 = vadd.f32 %v1323_v63, %v2328_v54  ;;  %v1857_v54 = vld [vmem:[%s2325_s0 + $0x30] sm:$0xff] }
 0x5d1   : > { %v1312_v29 = vpop.f32.mrb[34].mxu1 }
 0x5d2   : > { %1332 = vst [vmem:[%s2270_s28 + $0x8] sm:$0xff] %v1328_v26  ;;  %v1325_v38 = vmul.f32 %v1322_v32, %v1312_v29  ;;  %v1314_v3 = vpop.f32.mrb[35].mxu1  ;;  %1331 = vst [vmem:[%s2270_s28] sm:$0xff] %v1327_v14 }
 0x5d4   : > { %v1329_v41 = vadd.f32 %v1856_v51, %v1325_v38 }
 0x5d5   : > { %v1317_v20 = vpop.f32.mrb[36].mxu1 }
 0x5d6   : > { %1333 = vst [vmem:[%s2270_s28 + $0x10] sm:$0xff] %v1329_v41  ;;  %v1326_v49 = vmul.f32 %v1322_v32, %v1317_v20  ;;  %v1319_v55 = vpop.f32.mrb[37].mxu1 }
 0x5d8   : > { %v1330_v59 = vadd.f32 %v1857_v54, %v1326_v49 }
 0x5da   : > { %1334 = vst [vmem:[%s2270_s28 + $0x18] sm:$0xff] %v1330_v59 }
 0x5db   : > { %1929 = shalt.err (!%p1926_p5)
}
 0x5dc   : > { %s1930_s28 = scalar_lea.hbm %s2707_s3, 512  ;;  %s1934_s1 = scalar_lea.hbm %s2814_s25, 2048 }
 0x5dd   : > { %p1931_p8 = scmp.ne.s32.totalorder %s2707_s3, %s1930_s28  ;;  %p1935_p7 = scmp.lt.u32.totalorder %s2707_s3, %s2814_s25 }
 0x5de   : > { %p1936_p4 = scmp.lt.u32.totalorder %s1934_s1, %s1930_s28  ;;  %p1938_p1 = scmp.lt.u32.totalorder %s1930_s28, %s2707_s3 }
 0x5df   : > { %p1932_p10 = pnand %p1931_p8, %p2813_p2 }
 0x5e0   : > { %p1937_p0 = por %p1936_p4, %p1935_p7 }
 0x5e1   : > { %p1933_p12 = pneg %p1932_p10 }
 0x5e2   : > { %p1939_p6 = por %p1938_p1, %p1937_p0 }
 0x5e4   : > { %p1940_p9 = pnand %p1939_p6, %p1933_p12 }
 0x5e6   : > { %1943 = shalt.err (!%p1940_p9)
}
 0x5e7   : > { %s2057_s26 = smov 128   ;;  %s2058_s27 = smov 8  }
 0x5e8   : > { %1639 = dma.vmem_to_hbm [thread:$0]  (%p2813_p2), %s2709_s19, 512, %s2707_s3, %s1336_s17, %s2057_s26, %s2054_s2, %s2058_s27  }
 0x5e9 PF: > { %p1655_p3 = scmp.ge.s32.totalorder %s2042_s20, 2  ;;  %s1389_s9 = sand.u32 1, %s2002_s11  }
 0x5ea   : > { %p2815_p11 = scmp.ne.s32.totalorder %s2805_s8, 0  ;;  %s1390_s29 = scalar_lea.sflag [#allocation7], %s1389_s9 }
 0x5ec   : > { %p1648_p13 = pnand %p1655_p3, %p2815_p11 }
 0x5ee   : > { %1993 = dma.done.wait (!%p1648_p13), %s1390_s29, 512  }
 0x5ef   : > { %1995 = vsyncadd (!%p1648_p13), %s1390_s29, 4294966784  ;;  %s1399_s22 = scalar_lea.sflag [#allocation10], %s1389_s9 }
 0x5f0   : > { %1997 = dma.done.wait (!%p1648_p13), %s1399_s22, 4096  }
 0x5f1   : > { %1999 = vsyncadd (!%p1648_p13), %s1399_s22, 4294963200  ;;  %s30_s20 = sadd.s32 1, %s2042_s20   ;;  %s2816_s17 = sld [smem:[#allocation14_spill]] }
 0x5f2   : > { %p27_p5 = scmp.ge.s32.totalorder %s30_s20, 6   ;;  %s2817_s7 = sld [smem:[#allocation15_spill]] }
 0x5f3   : > { %s2818_s10 = sld [smem:[#allocation16_spill]]  ;;  %s2819_s19 = sld [smem:[#allocation17_spill]] }
 0x5f4   : > { %s2820_s11 = smov %s2006_s12  ;;  %s2821_s12 = smov %s2010_s13 }
 0x5f5   : > { %s2822_s13 = smov %s2202_s18  ;;  %s2823_s14 = smov %s2018_s15 }
 0x5f6   : > { %s2824_s15 = smov %s2022_s16  ;;  %s2825_s16 = smov %s2199_s23 }
 0x5f7   :  { %29 = sbr.rel (!%p27_p5) target bundleno = 19 (0x13), region = 119 }
 0x5f9   : > { %s2826_s18 = smov %s2818_s10 }
 0x5fe   :  { %1404 = vsyncpa [#allocation6], 1 }
 0x5ff   :  { %1406 = vsyncpa [#allocation6 + $0x1], 1 }
 0x600   :  { %1407 = vsyncpa [#allocation7], 1 }
 0x601   :  { %1409 = vsyncpa [#allocation7 + $0x1], 1 }
 0x602   :  { %1410 = vsyncpa [#allocation10], 1 }
 0x603   :  { %1412 = vsyncpa [#allocation10 + $0x1], 1 }

</bundles_post_ra>
